<compile_context>
chip_gen: v5e
topology: v5e:2x2
jax: 0.10.0
libtpu: 0.0.40
codegen_flags: <defaults>
</compile_context>

<pallas_src>
import jax
import jax.numpy as jnp
import numpy as np
from jax.experimental import pallas as pl
from jax.experimental.pallas import tpu as pltpu

PROJ_DIM = 1024          # nn.Linear(vision_dim, 1024) / nn.Linear(text_dim, 1024)
NORM_EPS = 1e-12         # F.normalize default eps
LANE = 128
_VMEM_SOFT_CAP = 32 * 1024 * 1024   # shrink TB until the 2-deep pipeline fits this
_VMEM_HARD_CAP = 48 * 1024 * 1024   # safe scoped-VMEM limit on v5e/v6e/v7x


def _round_up(x, m):
    return (x + m - 1) // m * m


def _clip_head_kernel(vis_ref, txt_ref, wv_ref, bv_ref, wt_ref, bt_ref,
                      vout_ref, tout_ref):
    S = vis_ref.shape[1]

    # ---- vision branch: TSNAVG consensus in f32, accumulated slice-by-slice
    #      (no (TB, S, Dv) f32 temporary; only a (TB, Dv) accumulator is live).
    acc = vis_ref[:, 0, :].astype(jnp.float32)
    for s in range(1, S):                      # S is static (block shape)
        acc = acc + vis_ref[:, s, :].astype(jnp.float32)
    pooled = acc * (1.0 / S)                   # (TB, Dv_pad) f32

    # vision_proj: bf16 MXU inputs, f32 accumulation, bias + normalize in f32.
    v = jnp.dot(pooled.astype(jnp.bfloat16), wv_ref[...],
                preferred_element_type=jnp.float32)        # (TB, 1024)
    v = v + bv_ref[...]
    inv_v = jax.lax.rsqrt(
        jnp.maximum(jnp.sum(v * v, axis=-1, keepdims=True), NORM_EPS * NORM_EPS))
    vout_ref[...] = (v * inv_v).astype(vout_ref.dtype)     # F.normalize, bf16 store

    # ---- text branch: text_proj + normalize ---------------------------------
    t = jnp.dot(txt_ref[...].astype(jnp.bfloat16), wt_ref[...],
                preferred_element_type=jnp.float32)        # (TB, 1024)
    t = t + bt_ref[...]
    inv_t = jax.lax.rsqrt(
        jnp.maximum(jnp.sum(t * t, axis=-1, keepdims=True), NORM_EPS * NORM_EPS))
    tout_ref[...] = (t * inv_t).astype(tout_ref.dtype)


def _vmem_bytes(TB, S, Dv, Dt, act_bytes):
    vis = 2 * TB * S * Dv * act_bytes          # double-buffered vision block
    txt = 2 * TB * Dt * act_bytes              # double-buffered text block
    outs = 2 * 2 * TB * PROJ_DIM * 2           # two bf16 outputs, 2 buffers each
    wts = 2 * (Dv + Dt) * PROJ_DIM * 2         # resident bf16 weights (count 2 bufs)
    bias = 2 * 2 * PROJ_DIM * 4
    return vis + txt + outs + wts + bias


def clip_forward(vision_feats, text_feats, params):
    """Returns (video_embedding, text_embedding, logit_scale.exp())."""
    B, S, Dv = vision_feats.shape
    Dt = text_feats.shape[1]
    Dv_pad = params["wv"].shape[0]             # weights pre-padded at init
    Dt_pad = params["wt"].shape[0]

    # Contraction dims must be zero-padded when not lane multiples (garbage in
    # K would corrupt valid rows).  No-op for the common CLIP dims.
    if Dv != Dv_pad:
        # TODO(synk): emit lane-padded features upstream to avoid this HBM pass.
        vision_feats = jnp.pad(vision_feats, ((0, 0), (0, 0), (0, Dv_pad - Dv)))
    if Dt != Dt_pad:
        text_feats = jnp.pad(text_feats, ((0, 0), (0, Dt_pad - Dt)))

    act_bytes = max(vision_feats.dtype.itemsize, text_feats.dtype.itemsize)
    TB = min(256, _round_up(B, 16))
    while TB > 16 and _vmem_bytes(TB, S, Dv_pad, Dt_pad, act_bytes) > _VMEM_SOFT_CAP:
        TB //= 2
    vmem_limit = int(min(_VMEM_HARD_CAP,
                         max(3 * _vmem_bytes(TB, S, Dv_pad, Dt_pad, act_bytes) // 2,
                             16 * 1024 * 1024)))

    grid = (pl.cdiv(B, TB),)                   # partial last block: OOB rows masked
    v_emb, t_emb = pl.pallas_call(
        _clip_head_kernel,
        out_shape=(jax.ShapeDtypeStruct((B, PROJ_DIM), jnp.bfloat16),
                   jax.ShapeDtypeStruct((B, PROJ_DIM), jnp.bfloat16)),
        grid=grid,
        in_specs=[
            # batch-tiled activations (double-buffered by the pipeline)
            pl.BlockSpec((TB, S, Dv_pad), lambda i: (i, 0, 0)),
            pl.BlockSpec((TB, Dt_pad), lambda i: (i, 0)),
            # weights/biases: constant block index -> resident in VMEM
            pl.BlockSpec((Dv_pad, PROJ_DIM), lambda i: (0, 0)),
            pl.BlockSpec((1, PROJ_DIM), lambda i: (0, 0)),
            pl.BlockSpec((Dt_pad, PROJ_DIM), lambda i: (0, 0)),
            pl.BlockSpec((1, PROJ_DIM), lambda i: (0, 0)),
        ],
        out_specs=(
            pl.BlockSpec((TB, PROJ_DIM), lambda i: (i, 0)),
            pl.BlockSpec((TB, PROJ_DIM), lambda i: (i, 0)),
        ),
        compiler_params=pltpu.CompilerParams(
            dimension_semantics=("parallel",),   # batch axis -> megacore/dual-TC split
            vmem_limit_bytes=vmem_limit,
        ),
    )(vision_feats, text_feats, params["wv"], params["bv"],
      params["wt"], params["bt"])

    # scalar glue: self.logit_scale.exp()  (left to XLA; negligible)
    logit_scale_exp = jnp.exp(params["logit_scale"])
    return v_emb, t_emb, logit_scale_exp


def init_params(key, vision_dim, text_dim):
    """Weights are padded to lane multiples and cast to bf16 ONCE here, so the
    forward pass never rebuilds padded copies."""
    k1, k2, k3, k4 = jax.random.split(key, 4)
    Dv_pad = _round_up(vision_dim, LANE)
    Dt_pad = _round_up(text_dim, LANE)
    # nn.Linear stores weight as (out, in); matmul layout here is (in, out).
    wv = jax.random.normal(k1, (vision_dim, PROJ_DIM), jnp.float32) * 0.02
    wt = jax.random.normal(k3, (text_dim, PROJ_DIM), jnp.float32) * 0.02
    return {
        "wv": jnp.zeros((Dv_pad, PROJ_DIM), jnp.bfloat16)
                 .at[:vision_dim].set(wv.astype(jnp.bfloat16)),
        "bv": jax.random.normal(k2, (1, PROJ_DIM), jnp.float32) * 0.02,
        "wt": jnp.zeros((Dt_pad, PROJ_DIM), jnp.bfloat16)
                 .at[:text_dim].set(wt.astype(jnp.bfloat16)),
        "bt": jax.random.normal(k4, (1, PROJ_DIM), jnp.float32) * 0.02,
        # self.logit_scale = nn.Parameter(torch.ones([]) * np.log(1/0.07))
        "logit_scale": jnp.asarray(np.log(1.0 / 0.07), jnp.float32),
    }


def _reference(vision_feats, text_feats, params):
    """Pure-JAX reference of the same head (f32 pooling, bf16 matmul inputs)."""
    Dv = vision_feats.shape[-1]
    Dt = text_feats.shape[-1]
    wv = params["wv"][:Dv].astype(jnp.float32)
    wt = params["wt"][:Dt].astype(jnp.float32)
    pooled = jnp.mean(vision_feats.astype(jnp.float32), axis=1)
    v = pooled.astype(jnp.bfloat16).astype(jnp.float32) @ wv + params["bv"]
    v = v / jnp.maximum(jnp.linalg.norm(v, axis=-1, keepdims=True), NORM_EPS)
    t = text_feats.astype(jnp.bfloat16).astype(jnp.float32) @ wt + params["bt"]
    t = t / jnp.maximum(jnp.linalg.norm(t, axis=-1, keepdims=True), NORM_EPS)
    return v, t


if __name__ == "__main__":
    # expected shape of 'features': (n_batch, 5, input_dim) per the docstring.
    # Dims chosen as (small) lane multiples so activations flow in unpadded.
    B, S, VISION_DIM, TEXT_DIM = 16, 5, 256, 128

    key = jax.random.PRNGKey(0)
    k_vis, k_txt, k_par = jax.random.split(key, 3)
    vision_feats = jax.random.normal(k_vis, (B, S, VISION_DIM), jnp.float32)
    text_feats = jax.random.normal(k_txt, (B, TEXT_DIM), jnp.float32)
    params = init_params(k_par, VISION_DIM, TEXT_DIM)

    v_emb, t_emb, scale = jax.jit(clip_forward)(vision_feats, text_feats, params)
    jax.block_until_ready((v_emb, t_emb, scale))

    # sanity: shapes, unit-norm embeddings (bf16 stores), reference match, scale
    assert v_emb.shape == (B, PROJ_DIM) and t_emb.shape == (B, PROJ_DIM)
    v_np = np.asarray(v_emb, dtype=np.float32)
    t_np = np.asarray(t_emb, dtype=np.float32)
    assert np.allclose(np.linalg.norm(v_np, axis=-1), 1.0, atol=1e-2)
    assert np.allclose(np.linalg.norm(t_np, axis=-1), 1.0, atol=1e-2)
    v_ref, t_ref = _reference(vision_feats, text_feats, params)
    assert np.allclose(v_np, np.asarray(v_ref), atol=2e-2)
    assert np.allclose(t_np, np.asarray(t_ref), atol=2e-2)
    assert np.allclose(float(scale), float(np.exp(np.log(1.0 / 0.07))), rtol=1e-6)

    print("KERNEL_OK")
</pallas_src>

<mosaic_0001>
module attributes {stable_mosaic.version = 11 : i64} {
  func.func @_clip_head_kernel(%arg0: i32, %arg1: memref<16x5x256xf32, #tpu.memory_space<vmem>>, %arg2: memref<16x128xf32, #tpu.memory_space<vmem>>, %arg3: memref<256x1024xbf16, #tpu.memory_space<vmem>>, %arg4: memref<1x1024xf32, #tpu.memory_space<vmem>>, %arg5: memref<128x1024xbf16, #tpu.memory_space<vmem>>, %arg6: memref<1x1024xf32, #tpu.memory_space<vmem>>, %arg7: memref<16x1024xbf16, #tpu.memory_space<vmem>>, %arg8: memref<16x1024xbf16, #tpu.memory_space<vmem>>) attributes {dimension_semantics = [#tpu.dimension_semantics<parallel>], iteration_bounds = array<i64: 1>, scalar_prefetch = 0 : i64, scratch_operands = 0 : i64, tpu.core_type = #tpu.core_type<tc>, window_params = [{transform_indices = @transform_0, window_bounds = array<i64: 16, 5, 256>}, {transform_indices = @transform_1, window_bounds = array<i64: 16, 128>}, {pipeline_mode = #tpu.pipeline_mode<synchronous>, transform_indices = @transform_2, window_bounds = array<i64: 256, 1024>}, {pipeline_mode = #tpu.pipeline_mode<synchronous>, transform_indices = @transform_3, window_bounds = array<i64: 1, 1024>}, {pipeline_mode = #tpu.pipeline_mode<synchronous>, transform_indices = @transform_4, window_bounds = array<i64: 128, 1024>}, {pipeline_mode = #tpu.pipeline_mode<synchronous>, transform_indices = @transform_5, window_bounds = array<i64: 1, 1024>}, {transform_indices = @transform_6, window_bounds = array<i64: 16, 1024>}, {transform_indices = @transform_7, window_bounds = array<i64: 16, 1024>}]} {
    %c0 = arith.constant 0 : index
    %c0_0 = arith.constant 0 : index
    %c0_1 = arith.constant 0 : index
    %0 = vector.load %arg1[%c0, %c0_0, %c0_1] : memref<16x5x256xf32, #tpu.memory_space<vmem>>, vector<16x1x256xf32>
    %1 = vector.shape_cast %0 : vector<16x1x256xf32> to vector<16x256xf32>
    %c0_2 = arith.constant 0 : index
    %c1 = arith.constant 1 : index
    %c0_3 = arith.constant 0 : index
    %2 = vector.load %arg1[%c0_2, %c1, %c0_3] : memref<16x5x256xf32, #tpu.memory_space<vmem>>, vector<16x1x256xf32>
    %3 = vector.shape_cast %2 : vector<16x1x256xf32> to vector<16x256xf32>
    %4 = arith.addf %1, %3 : vector<16x256xf32>
    %c0_4 = arith.constant 0 : index
    %c2 = arith.constant 2 : index
    %c0_5 = arith.constant 0 : index
    %5 = vector.load %arg1[%c0_4, %c2, %c0_5] : memref<16x5x256xf32, #tpu.memory_space<vmem>>, vector<16x1x256xf32>
    %6 = vector.shape_cast %5 : vector<16x1x256xf32> to vector<16x256xf32>
    %7 = arith.addf %4, %6 : vector<16x256xf32>
    %c0_6 = arith.constant 0 : index
    %c3 = arith.constant 3 : index
    %c0_7 = arith.constant 0 : index
    %8 = vector.load %arg1[%c0_6, %c3, %c0_7] : memref<16x5x256xf32, #tpu.memory_space<vmem>>, vector<16x1x256xf32>
    %9 = vector.shape_cast %8 : vector<16x1x256xf32> to vector<16x256xf32>
    %10 = arith.addf %7, %9 : vector<16x256xf32>
    %c0_8 = arith.constant 0 : index
    %c4 = arith.constant 4 : index
    %c0_9 = arith.constant 0 : index
    %11 = vector.load %arg1[%c0_8, %c4, %c0_9] : memref<16x5x256xf32, #tpu.memory_space<vmem>>, vector<16x1x256xf32>
    %12 = vector.shape_cast %11 : vector<16x1x256xf32> to vector<16x256xf32>
    %13 = arith.addf %10, %12 : vector<16x256xf32>
    %cst = arith.constant 2.000000e-01 : f32
    %14 = vector.broadcast %cst : f32 to vector<16x256xf32>
    %15 = arith.mulf %13, %14 : vector<16x256xf32>
    %16 = arith.truncf %15 : vector<16x256xf32> to vector<16x256xbf16>
    %c0_10 = arith.constant 0 : index
    %c0_11 = arith.constant 0 : index
    %17 = vector.load %arg3[%c0_10, %c0_11] : memref<256x1024xbf16, #tpu.memory_space<vmem>>, vector<256x1024xbf16>
    %cst_12 = arith.constant dense<0.000000e+00> : vector<16x1024xf32>
    %18 = tpu.matmul %16, %17, %cst_12 {dimension_numbers = #tpu.dot_dimension_numbers<[1], [0], [0], [1], [0, 0, 1, 1], [], []>} : vector<16x256xbf16>, vector<256x1024xbf16>, vector<16x1024xf32> -> vector<16x1024xf32>
    %c0_13 = arith.constant 0 : index
    %c0_14 = arith.constant 0 : index
    %19 = vector.load %arg4[%c0_13, %c0_14] : memref<1x1024xf32, #tpu.memory_space<vmem>>, vector<1x1024xf32>
    %20 = vector.broadcast %19 : vector<1x1024xf32> to vector<16x1024xf32>
    %21 = arith.addf %18, %20 : vector<16x1024xf32>
    %22 = arith.mulf %21, %21 : vector<16x1024xf32>
    %cst_15 = arith.constant dense<0.000000e+00> : vector<16xf32>
    %23 = vector.multi_reduction <add>, %22, %cst_15 [1] : vector<16x1024xf32> to vector<16xf32>
    %24 = vector.shape_cast %23 : vector<16xf32> to vector<16x1xf32>
    %cst_16 = arith.constant 1.000000e-24 : f32
    %25 = vector.broadcast %cst_16 : f32 to vector<16x1xf32>
    %26 = arith.maximumf %24, %25 : vector<16x1xf32>
    %27 = math.rsqrt %26 : vector<16x1xf32>
    %28 = vector.broadcast %27 : vector<16x1xf32> to vector<16x1024xf32>
    %29 = arith.mulf %21, %28 : vector<16x1024xf32>
    %30 = arith.truncf %29 : vector<16x1024xf32> to vector<16x1024xbf16>
    %c0_17 = arith.constant 0 : index
    %c0_18 = arith.constant 0 : index
    %31 = vector.load %arg7[%c0_17, %c0_18] : memref<16x1024xbf16, #tpu.memory_space<vmem>>, vector<16x1024xbf16>
    tpu.vector_store %arg7[%c0_17, %c0_18], %30 {strides = array<i32>} : memref<16x1024xbf16, #tpu.memory_space<vmem>>, vector<16x1024xbf16>,
    %c0_19 = arith.constant 0 : index
    %c0_20 = arith.constant 0 : index
    %32 = vector.load %arg2[%c0_19, %c0_20] : memref<16x128xf32, #tpu.memory_space<vmem>>, vector<16x128xf32>
    %33 = arith.truncf %32 : vector<16x128xf32> to vector<16x128xbf16>
    %c0_21 = arith.constant 0 : index
    %c0_22 = arith.constant 0 : index
    %34 = vector.load %arg5[%c0_21, %c0_22] : memref<128x1024xbf16, #tpu.memory_space<vmem>>, vector<128x1024xbf16>
    %cst_23 = arith.constant dense<0.000000e+00> : vector<16x1024xf32>
    %35 = tpu.matmul %33, %34, %cst_23 {dimension_numbers = #tpu.dot_dimension_numbers<[1], [0], [0], [1], [0, 0, 1, 1], [], []>} : vector<16x128xbf16>, vector<128x1024xbf16>, vector<16x1024xf32> -> vector<16x1024xf32>
    %c0_24 = arith.constant 0 : index
    %c0_25 = arith.constant 0 : index
    %36 = vector.load %arg6[%c0_24, %c0_25] : memref<1x1024xf32, #tpu.memory_space<vmem>>, vector<1x1024xf32>
    %37 = vector.broadcast %36 : vector<1x1024xf32> to vector<16x1024xf32>
    %38 = arith.addf %35, %37 : vector<16x1024xf32>
    %39 = arith.mulf %38, %38 : vector<16x1024xf32>
    %cst_26 = arith.constant dense<0.000000e+00> : vector<16xf32>
    %40 = vector.multi_reduction <add>, %39, %cst_26 [1] : vector<16x1024xf32> to vector<16xf32>
    %41 = vector.shape_cast %40 : vector<16xf32> to vector<16x1xf32>
    %cst_27 = arith.constant 1.000000e-24 : f32
    %42 = vector.broadcast %cst_27 : f32 to vector<16x1xf32>
    %43 = arith.maximumf %41, %42 : vector<16x1xf32>
    %44 = math.rsqrt %43 : vector<16x1xf32>
    %45 = vector.broadcast %44 : vector<16x1xf32> to vector<16x1024xf32>
    %46 = arith.mulf %38, %45 : vector<16x1024xf32>
    %47 = arith.truncf %46 : vector<16x1024xf32> to vector<16x1024xbf16>
    %c0_28 = arith.constant 0 : index
    %c0_29 = arith.constant 0 : index
    %48 = vector.load %arg8[%c0_28, %c0_29] : memref<16x1024xbf16, #tpu.memory_space<vmem>>, vector<16x1024xbf16>
    tpu.vector_store %arg8[%c0_28, %c0_29], %47 {strides = array<i32>} : memref<16x1024xbf16, #tpu.memory_space<vmem>>, vector<16x1024xbf16>,
    return
  }
  func.func @transform_0(%arg0: i32) -> (i32, i32, i32) {
    %c0_i32 = arith.constant 0 : i32
    %c0_i32_0 = arith.constant 0 : i32
    %c0_i32_1 = arith.constant 0 : i32
    return %arg0, %c0_i32, %c0_i32_0 : i32, i32, i32
  }
  func.func @transform_1(%arg0: i32) -> (i32, i32) {
    %c0_i32 = arith.constant 0 : i32
    %c0_i32_0 = arith.constant 0 : i32
    return %arg0, %c0_i32 : i32, i32
  }
  func.func @transform_2(%arg0: i32) -> (i32, i32) {
    %c0_i32 = arith.constant 0 : i32
    %c0_i32_0 = arith.constant 0 : i32
    %c0_i32_1 = arith.constant 0 : i32
    return %c0_i32, %c0_i32_0 : i32, i32
  }
  func.func @transform_3(%arg0: i32) -> (i32, i32) {
    %c0_i32 = arith.constant 0 : i32
    %c0_i32_0 = arith.constant 0 : i32
    %c0_i32_1 = arith.constant 0 : i32
    return %c0_i32, %c0_i32_0 : i32, i32
  }
  func.func @transform_4(%arg0: i32) -> (i32, i32) {
    %c0_i32 = arith.constant 0 : i32
    %c0_i32_0 = arith.constant 0 : i32
    %c0_i32_1 = arith.constant 0 : i32
    return %c0_i32, %c0_i32_0 : i32, i32
  }
  func.func @transform_5(%arg0: i32) -> (i32, i32) {
    %c0_i32 = arith.constant 0 : i32
    %c0_i32_0 = arith.constant 0 : i32
    %c0_i32_1 = arith.constant 0 : i32
    return %c0_i32, %c0_i32_0 : i32, i32
  }
  func.func @transform_6(%arg0: i32) -> (i32, i32) {
    %c0_i32 = arith.constant 0 : i32
    %c0_i32_0 = arith.constant 0 : i32
    return %arg0, %c0_i32 : i32, i32
  }
  func.func @transform_7(%arg0: i32) -> (i32, i32) {
    %c0_i32 = arith.constant 0 : i32
    %c0_i32_0 = arith.constant 0 : i32
    return %arg0, %c0_i32 : i32, i32
  }
}

</mosaic_0001>

<bundles_post_ra>
// kernel: clip_forward.1
= control target key start
LH: loop header
LB: loop body
LE: loop exit
PB: predicated region body
PF: predicated region fallthrough
CT: control target
= control target key end

     0   :  { %13 = vsyncpa [#allocation3], 0  ;;  %s4063_s0 = inlined_call_operand.vmem [shape: f32[16,5,256], index: 0, kind: input, shape index: {}]   ;;  %s4064_s1 = inlined_call_operand.vmem [shape: f32[16,128], index: 1, kind: input, shape index: {}]   ;;  %s4065_s2 = inlined_call_operand.hbm [shape: bf16[256,1024], index: 2, kind: input, shape index: {}]   ;;  %s4066_s3 = inlined_call_operand.vmem [shape: f32[1,1024], index: 3, kind: input, shape index: {}]   ;;  %s4067_s4 = inlined_call_operand.hbm [shape: bf16[128,1024], index: 4, kind: input, shape index: {}]   ;;  %s4068_s5 = inlined_call_operand.vmem [shape: f32[1,1024], index: 5, kind: input, shape index: {}]   ;;  %s4069_s6 = inlined_call_operand.hbm [shape: bf16[16,1024], index: 6, kind: output, shape index: {0}]   ;;  %s4070_s7 = inlined_call_operand.hbm [shape: bf16[16,1024], index: 7, kind: output, shape index: {1}]  }
   0x1   :  { %14 = vsyncpa [#allocation6], 0 }
   0x2   :  { %15 = vsyncpa [#allocation4], 0 }
   0x3   :  { %16 = vsyncpa [#allocation9], 0  ;;  %s25_s26 = sshll.u32 %s4065_s2, 4  ;;  %s3439_s27 = smov [#allocation2]   ;;  %s26_s26 = int_to_ptr.hbm [resolvable:$true] %s25_s26 }
   0x4   :  { %s27_s28 = sshll.u32 %s3439_s27, 4  ;;  %s40_s8 = sshll.u32 %s4067_s4, 4  ;;  %s28_s28 = int_to_ptr.vmem [resolvable:$true] %s27_s28  ;;  %s41_s8 = int_to_ptr.hbm [resolvable:$true] %s40_s8 }
   0x5   :  { %s3440_s9 = smov 512   ;;  %s3441_s10 = smov 32  }
   0x6   :  { %33 = dma.hbm_to_vmem [thread:$0]  %s26_s26, 16384, %s28_s28, [#allocation3], %s3440_s9, %s3440_s9, %s3441_s10  }
   0x7   :  { %s3442_s11 = smov [#allocation5]  }
   0x8   :  { %s42_s12 = sshll.u32 %s3442_s11, 4  ;;  %s43_s12 = int_to_ptr.vmem [resolvable:$true] %s42_s12 }
   0x9   :  { %48 = dma.hbm_to_vmem [thread:$0]  %s41_s8, 8192, %s43_s12, [#allocation6], %s3440_s9, %s3440_s9, %s3441_s10  }
   0xa   :  { %3431 = dma.done.wait [#allocation3], 16384  }
   0xb   :  { %3432 = vsyncadd [#allocation3], 4294950912 }
   0xc   :  { %3433 = dma.done.wait [#allocation6], 8192  }
   0xd   :  { %3434 = vsyncadd [#allocation6], 4294959104  ;;  %v2587_v0 = vld [vmem:[#allocation2 + $0x1c0] sm:$0xf]  ;;  %v3185_v5 = vld [vmem:[#allocation2 + $0x1c4] sm:$0xf] }
   0xe   :  { %v3189_v1 = vld [vmem:[#allocation2 + $0x1dc] sm:$0xf0]  ;;  %v2589_v6 = vld [vmem:[#allocation2 + $0x1e0] sm:$0xf0]  ;;  %vm621_vm0 = vcmask 1041409   ;;  %vm624_vm1 = vcmask 1042434  }
   0xf   :  { %v2843_v2 = vld [vmem:[#allocation2 + $0x3c0] sm:$0xf]  ;;  %v2588_v3 = vor.u32 %v3189_v1, %v2587_v0  ;;  %v2592_v8 = vor.u32 %v3185_v5, %v2589_v6  ;;  %v3249_v9 = vld [vmem:[#allocation2 + $0x3c4] sm:$0xf]  ;;  %vm627_vm2 = vcmask 1043459   ;;  %vm630_vm3 = vcmask 1044484  }
  0x10   :  { %v3253_v4 = vld [vmem:[#allocation2 + $0x3dc] sm:$0xf0]  ;;  %v2845_v10 = vld [vmem:[#allocation2 + $0x3e0] sm:$0xf0]  ;;  %vm633_vm4 = vcmask 1045509   ;;  %vm636_vm5 = vcmask 1046534  }
  0x11   :  { %v2844_v7 = vor.u32 %v3253_v4, %v2843_v2  ;;  %v2555_v11 = vld [vmem:[#allocation2 + $0x180] sm:$0xf]  ;;  %1327 = vmatpush.bf16.msra.mxu0 %v2588_v3  ;;  %v2848_v12 = vor.u32 %v3249_v9, %v2845_v10  ;;  %1355 = vmatpush.bf16.msra.mxu2 %v2592_v8  ;;  %v3177_v18 = vld [vmem:[#allocation2 + $0x184] sm:$0xf]  ;;  %vm639_vm6 = vcmask 1047559   ;;  %s2250_s18 = sshll.u32 %s4069_s6, 4  ;;  %s2251_s18 = int_to_ptr.hbm [resolvable:$true] %s2250_s18 }
  0x12   :  { %v3181_v13 = vld [vmem:[#allocation2 + $0x19c] sm:$0xf0]  ;;  %v2557_v19 = vld [vmem:[#allocation2 + $0x1a0] sm:$0xf0]  ;;  %s3444_s6 = smov [#allocation8]   ;;  %s2263_s22 = sshll.u32 %s4070_s7, 4  ;;  %s2264_s22 = int_to_ptr.hbm [resolvable:$true] %s2263_s22 }
  0x13   :  { %v2811_v14 = vld [vmem:[#allocation2 + $0x380] sm:$0xf]  ;;  %1341 = vmatpush.bf16.msra.mxu1 %v2844_v7  ;;  %v2556_v16 = vor.u32 %v3181_v13, %v2555_v11  ;;  %v3241_v20 = vld [vmem:[#allocation2 + $0x384] sm:$0xf]  ;;  %1369 = vmatpush.bf16.msra.mxu3 %v2848_v12  ;;  %v2560_v21 = vor.u32 %v3177_v18, %v2557_v19  ;;  %s2261_s19 = sshll.u32 %s3444_s6, 4  ;;  %s2262_s19 = int_to_ptr.vmem [resolvable:$true] %s2261_s19 }
  0x14   :  { %v3245_v15 = vld [vmem:[#allocation2 + $0x39c] sm:$0xf0]  ;;  %v2813_v22 = vld [vmem:[#allocation2 + $0x3a0] sm:$0xf0] }
  0x15   :  { %v2812_v17 = vor.u32 %v3245_v15, %v2811_v14  ;;  %v2523_v23 = vld [vmem:[#allocation2 + $0x140] sm:$0xf]  ;;  %v2816_v25 = vor.u32 %v3241_v20, %v2813_v22  ;;  %v3169_v28 = vld [vmem:[#allocation2 + $0x144] sm:$0xf]  ;;  %1328 = vmatpush.bf16.msra.mxu0 %v2556_v16  ;;  %1356 = vmatpush.bf16.msra.mxu2 %v2560_v21 }
  0x16   :  { %v3173_v24 = vld [vmem:[#allocation2 + $0x15c] sm:$0xf0]  ;;  %v2525_v30 = vld [vmem:[#allocation2 + $0x160] sm:$0xf0] }
  0x17   :  { %v2779_v26 = vld [vmem:[#allocation2 + $0x340] sm:$0xf]  ;;  %v2524_v29 = vor.u32 %v3173_v24, %v2523_v23  ;;  %v3233_v31 = vld [vmem:[#allocation2 + $0x344] sm:$0xf]  ;;  %1342 = vmatpush.bf16.msra.mxu1 %v2812_v17  ;;  %v2528_v34 = vor.u32 %v3169_v28, %v2525_v30  ;;  %1370 = vmatpush.bf16.msra.mxu3 %v2816_v25  ;;  %v2595_v28 = vld [vmem:[#allocation2 + $0x1c8] sm:$0xf] }
  0x18   :  { %v3237_v27 = vld [vmem:[#allocation2 + $0x35c] sm:$0xf0]  ;;  %v2781_v32 = vld [vmem:[#allocation2 + $0x360] sm:$0xf0]  ;;  %v2851_v30 = vld [vmem:[#allocation2 + $0x3c8] sm:$0xf] }
  0x19   :  { %v2780_v33 = vor.u32 %v3237_v27, %v2779_v26  ;;  %v2491_v35 = vld [vmem:[#allocation2 + $0x100] sm:$0xf]  ;;  %v2784_v38 = vor.u32 %v3233_v31, %v2781_v32  ;;  %v3161_v40 = vld [vmem:[#allocation2 + $0x104] sm:$0xf]  ;;  %1329 = vmatpush.bf16.msra.mxu0 %v2524_v29  ;;  %1357 = vmatpush.bf16.msra.mxu2 %v2528_v34  ;;  %v3190_v29 = vld [vmem:[#allocation2 + $0x1e4] sm:$0xf0] }
  0x1a   :  { %v3165_v36 = vld [vmem:[#allocation2 + $0x11c] sm:$0xf0]  ;;  %v2493_v41 = vld [vmem:[#allocation2 + $0x120] sm:$0xf0]  ;;  %v3254_v32 = vld [vmem:[#allocation2 + $0x3e4] sm:$0xf0] }
  0x1b   :  { %v2747_v37 = vld [vmem:[#allocation2 + $0x300] sm:$0xf]  ;;  %v3225_v42 = vld [vmem:[#allocation2 + $0x304] sm:$0xf]  ;;  %v2492_v44 = vor.u32 %v3165_v36, %v2491_v35  ;;  %1343 = vmatpush.bf16.msra.mxu1 %v2780_v33  ;;  %v2496_v46 = vor.u32 %v3161_v40, %v2493_v41  ;;  %1371 = vmatpush.bf16.msra.mxu3 %v2784_v38  ;;  %v3186_v33 = vld [vmem:[#allocation2 + $0x1cc] sm:$0xf]  ;;  %v2596_v40 = vor.u32 %v3190_v29, %v2595_v28 }
  0x1c   :  { %v3229_v39 = vld [vmem:[#allocation2 + $0x31c] sm:$0xf0]  ;;  %v2749_v43 = vld [vmem:[#allocation2 + $0x320] sm:$0xf0]  ;;  %v2597_v34 = vld [vmem:[#allocation2 + $0x1e8] sm:$0xf0]  ;;  %v2852_v41 = vor.u32 %v3254_v32, %v2851_v30 }
  0x1d   :  { %v2748_v45 = vor.u32 %v3229_v39, %v2747_v37  ;;  %v2459_v47 = vld [vmem:[#allocation2 + $0xc0] sm:$0xf]  ;;  %v2752_v50 = vor.u32 %v3225_v42, %v2749_v43  ;;  %v3153_v52 = vld [vmem:[#allocation2 + $0xc4] sm:$0xf]  ;;  %1330 = vmatpush.bf16.msra.mxu0 %v2492_v44  ;;  %1358 = vmatpush.bf16.msra.mxu2 %v2496_v46  ;;  %v3250_v37 = vld [vmem:[#allocation2 + $0x3cc] sm:$0xf]  ;;  %v2600_v42 = vor.u32 %v3186_v33, %v2597_v34 }
  0x1e   :  { %v3157_v48 = vld [vmem:[#allocation2 + $0xdc] sm:$0xf0]  ;;  %v2461_v53 = vld [vmem:[#allocation2 + $0xe0] sm:$0xf0]  ;;  %v2853_v38 = vld [vmem:[#allocation2 + $0x3e8] sm:$0xf0] }
  0x1f   :  { %v2715_v49 = vld [vmem:[#allocation2 + $0x2c0] sm:$0xf]  ;;  %v3217_v54 = vld [vmem:[#allocation2 + $0x2c4] sm:$0xf]  ;;  %v2460_v56 = vor.u32 %v3157_v48, %v2459_v47  ;;  %1344 = vmatpush.bf16.msra.mxu1 %v2748_v45  ;;  %v2464_v58 = vor.u32 %v3153_v52, %v2461_v53  ;;  %1372 = vmatpush.bf16.msra.mxu3 %v2752_v50  ;;  %v2563_v43 = vld [vmem:[#allocation2 + $0x188] sm:$0xf]  ;;  %v2856_v46 = vor.u32 %v3250_v37, %v2853_v38 }
  0x20   :  { %v3221_v51 = vld [vmem:[#allocation2 + $0x2dc] sm:$0xf0]  ;;  %v2717_v55 = vld [vmem:[#allocation2 + $0x2e0] sm:$0xf0]  ;;  %v3182_v44 = vld [vmem:[#allocation2 + $0x1a4] sm:$0xf0] }
  0x21   :  { %v2716_v57 = vor.u32 %v3221_v51, %v2715_v49  ;;  %v2427_v59 = vld [vmem:[#allocation2 + $0x80] sm:$0xf]  ;;  %v2720_v62 = vor.u32 %v3217_v54, %v2717_v55  ;;  %v3145_v0 = vld [vmem:[#allocation2 + $0x84] sm:$0xf]  ;;  %1331 = vmatpush.bf16.msra.mxu0 %v2460_v56  ;;  %1359 = vmatpush.bf16.msra.mxu2 %v2464_v58  ;;  %v2819_v45 = vld [vmem:[#allocation2 + $0x388] sm:$0xf]  ;;  %v2564_v52 = vor.u32 %v3182_v44, %v2563_v43 }
  0x22   :  { %v3149_v60 = vld [vmem:[#allocation2 + $0x9c] sm:$0xf0]  ;;  %v2429_v1 = vld [vmem:[#allocation2 + $0xa0] sm:$0xf0]  ;;  %v3246_v47 = vld [vmem:[#allocation2 + $0x3a4] sm:$0xf0] }
  0x23   :  { %v2683_v61 = vld [vmem:[#allocation2 + $0x280] sm:$0xf]  ;;  %v3209_v2 = vld [vmem:[#allocation2 + $0x284] sm:$0xf]  ;;  %v2428_v4 = vor.u32 %v3149_v60, %v2427_v59  ;;  %1345 = vmatpush.bf16.msra.mxu1 %v2716_v57  ;;  %v2432_v6 = vor.u32 %v3145_v0, %v2429_v1  ;;  %1373 = vmatpush.bf16.msra.mxu3 %v2720_v62  ;;  %v3178_v48 = vld [vmem:[#allocation2 + $0x18c] sm:$0xf]  ;;  %v2820_v53 = vor.u32 %v3246_v47, %v2819_v45 }
  0x24   :  { %v3213_v63 = vld [vmem:[#allocation2 + $0x29c] sm:$0xf0]  ;;  %v2685_v3 = vld [vmem:[#allocation2 + $0x2a0] sm:$0xf0]  ;;  %v2565_v49 = vld [vmem:[#allocation2 + $0x1a8] sm:$0xf0] }
  0x25   :  { %v2684_v5 = vor.u32 %v3213_v63, %v2683_v61  ;;  %v2395_v7 = vld [vmem:[#allocation2 + $0x40] sm:$0xf]  ;;  %v2688_v10 = vor.u32 %v3209_v2, %v2685_v3  ;;  %v3137_v12 = vld [vmem:[#allocation2 + $0x44] sm:$0xf]  ;;  %1332 = vmatpush.bf16.msra.mxu0 %v2428_v4  ;;  %1360 = vmatpush.bf16.msra.mxu2 %v2432_v6  ;;  %v3242_v50 = vld [vmem:[#allocation2 + $0x38c] sm:$0xf]  ;;  %v2568_v54 = vor.u32 %v3178_v48, %v2565_v49 }
  0x26   :  { %v3141_v8 = vld [vmem:[#allocation2 + $0x5c] sm:$0xf0]  ;;  %v2397_v13 = vld [vmem:[#allocation2 + $0x60] sm:$0xf0]  ;;  %v2821_v51 = vld [vmem:[#allocation2 + $0x3a8] sm:$0xf0] }
  0x27   :  { %v2651_v9 = vld [vmem:[#allocation2 + $0x240] sm:$0xf]  ;;  %v3201_v14 = vld [vmem:[#allocation2 + $0x244] sm:$0xf]  ;;  %v2396_v16 = vor.u32 %v3141_v8, %v2395_v7  ;;  %1346 = vmatpush.bf16.msra.mxu1 %v2684_v5  ;;  %v2400_v20 = vor.u32 %v3137_v12, %v2397_v13  ;;  %1374 = vmatpush.bf16.msra.mxu3 %v2688_v10  ;;  %v2531_v55 = vld [vmem:[#allocation2 + $0x148] sm:$0xf]  ;;  %v2824_v58 = vor.u32 %v3242_v50, %v2821_v51 }
  0x28   :  { %v3205_v11 = vld [vmem:[#allocation2 + $0x25c] sm:$0xf0]  ;;  %v2653_v15 = vld [vmem:[#allocation2 + $0x260] sm:$0xf0]  ;;  %v3174_v56 = vld [vmem:[#allocation2 + $0x164] sm:$0xf0] }
  0x29   :  { %v2363_v17 = vld [vmem:[#allocation2] sm:$0xf]  ;;  %v2652_v19 = vor.u32 %v3205_v11, %v2651_v9  ;;  %v3129_v23 = vld [vmem:[#allocation2 + $0x4] sm:$0xf]  ;;  %v2656_v24 = vor.u32 %v3201_v14, %v2653_v15  ;;  %1333 = vmatpush.bf16.msra.mxu0 %v2396_v16  ;;  %1361 = vmatpush.bf16.msra.mxu2 %v2400_v20  ;;  %v2787_v57 = vld [vmem:[#allocation2 + $0x348] sm:$0xf]  ;;  %v2532_v0 = vor.u32 %v3174_v56, %v2531_v55 }
  0x2a   :  { %v3133_v18 = vld [vmem:[#allocation2 + $0x1c] sm:$0xf0]  ;;  %v2365_v25 = vld [vmem:[#allocation2 + $0x20] sm:$0xf0]  ;;  %v3238_v59 = vld [vmem:[#allocation2 + $0x364] sm:$0xf0] }
  0x2b   :  { %v2619_v21 = vld [vmem:[#allocation2 + $0x200] sm:$0xf]  ;;  %v3193_v26 = vld [vmem:[#allocation2 + $0x204] sm:$0xf]  ;;  %v2364_v31 = vor.u32 %v3133_v18, %v2363_v17  ;;  %1347 = vmatpush.bf16.msra.mxu1 %v2652_v19  ;;  %v2368_v36 = vor.u32 %v3129_v23, %v2365_v25  ;;  %1375 = vmatpush.bf16.msra.mxu3 %v2656_v24  ;;  %v3170_v60 = vld [vmem:[#allocation2 + $0x14c] sm:$0xf]  ;;  %v2788_v1 = vor.u32 %v3238_v59, %v2787_v57 }
  0x2c   :  { %v3197_v22 = vld [vmem:[#allocation2 + $0x21c] sm:$0xf0]  ;;  %v2621_v27 = vld [vmem:[#allocation2 + $0x220] sm:$0xf0]  ;;  %v2533_v61 = vld [vmem:[#allocation2 + $0x168] sm:$0xf0] }
  0x2d   :  { %v2620_v35 = vor.u32 %v3197_v22, %v2619_v21  ;;  %v2624_v39 = vor.u32 %v3193_v26, %v2621_v27  ;;  %1334 = vmatpush.bf16.msra.mxu0 %v2364_v31  ;;  %1362 = vmatpush.bf16.msra.mxu2 %v2368_v36  ;;  %v3234_v62 = vld [vmem:[#allocation2 + $0x34c] sm:$0xf]  ;;  %v2536_v2 = vor.u32 %v3170_v60, %v2533_v61  ;;  %v2499_v3 = vld [vmem:[#allocation2 + $0x108] sm:$0xf] }
  0x2e   :  { %v2789_v63 = vld [vmem:[#allocation2 + $0x368] sm:$0xf0]  ;;  %v3166_v4 = vld [vmem:[#allocation2 + $0x124] sm:$0xf0] }
  0x2f   :  { %1348 = vmatpush.bf16.msra.mxu1 %v2620_v35  ;;  %1376 = vmatpush.bf16.msra.mxu3 %v2624_v39  ;;  %v2755_v5 = vld [vmem:[#allocation2 + $0x308] sm:$0xf]  ;;  %v2792_v6 = vor.u32 %v3234_v62, %v2789_v63  ;;  %v3162_v8 = vld [vmem:[#allocation2 + $0x10c] sm:$0xf]  ;;  %v2500_v12 = vor.u32 %v3166_v4, %v2499_v3 }
  0x30   :  { %v3230_v7 = vld [vmem:[#allocation2 + $0x324] sm:$0xf0]  ;;  %v2501_v9 = vld [vmem:[#allocation2 + $0x128] sm:$0xf0] }
  0x31   :  { %1383 = vmatpush.bf16.msrb.mxu0 %v2596_v40  ;;  %1411 = vmatpush.bf16.msrb.mxu2 %v2600_v42  ;;  %v3226_v10 = vld [vmem:[#allocation2 + $0x30c] sm:$0xf]  ;;  %v2756_v13 = vor.u32 %v3230_v7, %v2755_v5  ;;  %v2504_v14 = vor.u32 %v3162_v8, %v2501_v9  ;;  %v59_v16 = vld [vmem:[%s4063_s0] ss:$8 sm:$0x3] }
  0x32   :  { %v2757_v11 = vld [vmem:[#allocation2 + $0x328] sm:$0xf0]  ;;  %v2282_v17 = vld [vmem:[%s4063_s0 + $0x10] ss:$8 sm:$0x3] }
  0x33   :  { %1397 = vmatpush.bf16.msrb.mxu1 %v2852_v41  ;;  %1425 = vmatpush.bf16.msrb.mxu3 %v2856_v46  ;;  %v2760_v15 = vor.u32 %v3226_v10, %v2757_v11  ;;  %v2297_v18 = vld [vmem:[%s4063_s0 + $0x1] ss:$8 sm:$0x3]  ;;  %v2298_v19 = vld [vmem:[%s4063_s0 + $0x11] ss:$8 sm:$0x3] }
  0x34   :  { %v2283_v20 = vld [vmem:[%s4063_s0 + $0x20] ss:$8 sm:$0x3]  ;;  %v2284_v21 = vld [vmem:[%s4063_s0 + $0x30] ss:$8 sm:$0x3]  ;;  %v122_v50 = vadd.f32 %v2297_v18, %v59_v16  ;;  %v123_v51 = vadd.f32 %v2298_v19, %v2282_v17 }
  0x35   :  { %1384 = vmatpush.bf16.msrb.mxu0 %v2564_v52  ;;  %1412 = vmatpush.bf16.msrb.mxu2 %v2568_v54  ;;  %v2285_v22 = vld [vmem:[%s4063_s0 + $0x40] ss:$8 sm:$0x3]  ;;  %v2299_v23 = vld [vmem:[%s4063_s0 + $0x21] ss:$8 sm:$0x3] }
  0x36   :  { %v2300_v24 = vld [vmem:[%s4063_s0 + $0x31] ss:$8 sm:$0x3]  ;;  %v2301_v25 = vld [vmem:[%s4063_s0 + $0x41] ss:$8 sm:$0x3]  ;;  %v124_v55 = vadd.f32 %v2299_v23, %v2283_v20 }
  0x37   :  { %1398 = vmatpush.bf16.msrb.mxu1 %v2820_v53  ;;  %1426 = vmatpush.bf16.msrb.mxu3 %v2824_v58  ;;  %v2286_v26 = vld [vmem:[%s4063_s0 + $0x50] ss:$8 sm:$0x3]  ;;  %v2287_v27 = vld [vmem:[%s4063_s0 + $0x60] ss:$8 sm:$0x3]  ;;  %v125_v56 = vadd.f32 %v2300_v24, %v2284_v21  ;;  %v126_v57 = vadd.f32 %v2301_v25, %v2285_v22 }
  0x38   :  { %v2288_v28 = vld [vmem:[%s4063_s0 + $0x70] ss:$8 sm:$0x3]  ;;  %v2289_v29 = vld [vmem:[%s4063_s0 + $0x80] ss:$8 sm:$0x3] }
  0x39   :  { %1385 = vmatpush.bf16.msrb.mxu0 %v2532_v0  ;;  %1413 = vmatpush.bf16.msrb.mxu2 %v2536_v2  ;;  %v2302_v30 = vld [vmem:[%s4063_s0 + $0x51] ss:$8 sm:$0x3]  ;;  %v2303_v31 = vld [vmem:[%s4063_s0 + $0x61] ss:$8 sm:$0x3] }
  0x3a   :  { %v2304_v32 = vld [vmem:[%s4063_s0 + $0x71] ss:$8 sm:$0x3]  ;;  %v2305_v33 = vld [vmem:[%s4063_s0 + $0x81] ss:$8 sm:$0x3]  ;;  %v127_v62 = vadd.f32 %v2302_v30, %v2286_v26  ;;  %v128_v63 = vadd.f32 %v2303_v31, %v2287_v27 }
  0x3b   :  { %1399 = vmatpush.bf16.msrb.mxu1 %v2788_v1  ;;  %1427 = vmatpush.bf16.msrb.mxu3 %v2792_v6  ;;  %v2290_v34 = vld [vmem:[%s4063_s0 + $0x90] ss:$8 sm:$0x3]  ;;  %v2291_v35 = vld [vmem:[%s4063_s0 + $0xa0] ss:$8 sm:$0x3]  ;;  %v129_v0 = vadd.f32 %v2304_v32, %v2288_v28  ;;  %v130_v1 = vadd.f32 %v2305_v33, %v2289_v29 }
  0x3c   :  { %v2292_v36 = vld [vmem:[%s4063_s0 + $0xb0] ss:$8 sm:$0x3]  ;;  %v2293_v37 = vld [vmem:[%s4063_s0 + $0xc0] ss:$8 sm:$0x3] }
  0x3d   :  { %1386 = vmatpush.bf16.msrb.mxu0 %v2500_v12  ;;  %1414 = vmatpush.bf16.msrb.mxu2 %v2504_v14  ;;  %v2306_v38 = vld [vmem:[%s4063_s0 + $0x91] ss:$8 sm:$0x3]  ;;  %v2307_v39 = vld [vmem:[%s4063_s0 + $0xa1] ss:$8 sm:$0x3] }
  0x3e   :  { %v2308_v40 = vld [vmem:[%s4063_s0 + $0xb1] ss:$8 sm:$0x3]  ;;  %v2309_v41 = vld [vmem:[%s4063_s0 + $0xc1] ss:$8 sm:$0x3]  ;;  %v131_v6 = vadd.f32 %v2306_v38, %v2290_v34  ;;  %v132_v7 = vadd.f32 %v2307_v39, %v2291_v35 }
  0x3f   :  { %1400 = vmatpush.bf16.msrb.mxu1 %v2756_v13  ;;  %1428 = vmatpush.bf16.msrb.mxu3 %v2760_v15  ;;  %v2294_v42 = vld [vmem:[%s4063_s0 + $0xd0] ss:$8 sm:$0x3]  ;;  %v2295_v43 = vld [vmem:[%s4063_s0 + $0xe0] ss:$8 sm:$0x3]  ;;  %v133_v8 = vadd.f32 %v2308_v40, %v2292_v36  ;;  %v134_v9 = vadd.f32 %v2309_v41, %v2293_v37 }
  0x40   :  { %v2310_v44 = vld [vmem:[%s4063_s0 + $0xd1] ss:$8 sm:$0x3]  ;;  %v2311_v45 = vld [vmem:[%s4063_s0 + $0xe1] ss:$8 sm:$0x3] }
  0x41   :  { %v2313_v46 = vld [vmem:[%s4063_s0 + $0x2] ss:$8 sm:$0x3]  ;;  %v2314_v47 = vld [vmem:[%s4063_s0 + $0x12] ss:$8 sm:$0x3]  ;;  %v135_v14 = vadd.f32 %v2310_v44, %v2294_v42  ;;  %v136_v15 = vadd.f32 %v2311_v45, %v2295_v43 }
  0x42   :  { %v2296_v48 = vld [vmem:[%s4063_s0 + $0xf0] ss:$8 sm:$0x3]  ;;  %v2312_v49 = vld [vmem:[%s4063_s0 + $0xf1] ss:$8 sm:$0x3]  ;;  %v170_v17 = vadd.f32 %v2313_v46, %v122_v50  ;;  %v171_v18 = vadd.f32 %v2314_v47, %v123_v51 }
  0x43   :  { %v2315_v52 = vld [vmem:[%s4063_s0 + $0x22] ss:$8 sm:$0x3]  ;;  %v2316_v53 = vld [vmem:[%s4063_s0 + $0x32] ss:$8 sm:$0x3]  ;;  %v137_v22 = vadd.f32 %v2312_v49, %v2296_v48 }
  0x44   :  { %v2317_v54 = vld [vmem:[%s4063_s0 + $0x42] ss:$8 sm:$0x3]  ;;  %v2318_v58 = vld [vmem:[%s4063_s0 + $0x52] ss:$8 sm:$0x3]  ;;  %v172_v23 = vadd.f32 %v2315_v52, %v124_v55  ;;  %v173_v24 = vadd.f32 %v2316_v53, %v125_v56 }
  0x45   :  { %v2319_v59 = vld [vmem:[%s4063_s0 + $0x62] ss:$8 sm:$0x3]  ;;  %v2320_v60 = vld [vmem:[%s4063_s0 + $0x72] ss:$8 sm:$0x3]  ;;  %v174_v25 = vadd.f32 %v2317_v54, %v126_v57  ;;  %v175_v30 = vadd.f32 %v2318_v58, %v127_v62 }
  0x46   :  { %v2321_v61 = vld [vmem:[%s4063_s0 + $0x82] ss:$8 sm:$0x3]  ;;  %v2322_v2 = vld [vmem:[%s4063_s0 + $0x92] ss:$8 sm:$0x3]  ;;  %v176_v31 = vadd.f32 %v2319_v59, %v128_v63  ;;  %v177_v32 = vadd.f32 %v2320_v60, %v129_v0 }
  0x47   :  { %v2323_v3 = vld [vmem:[%s4063_s0 + $0xa2] ss:$8 sm:$0x3]  ;;  %v2324_v4 = vld [vmem:[%s4063_s0 + $0xb2] ss:$8 sm:$0x3]  ;;  %v178_v33 = vadd.f32 %v2321_v61, %v130_v1  ;;  %v179_v38 = vadd.f32 %v2322_v2, %v131_v6 }
  0x48   :  { %v2325_v5 = vld [vmem:[%s4063_s0 + $0xc2] ss:$8 sm:$0x3]  ;;  %v2326_v10 = vld [vmem:[%s4063_s0 + $0xd2] ss:$8 sm:$0x3]  ;;  %v180_v39 = vadd.f32 %v2323_v3, %v132_v7  ;;  %v181_v40 = vadd.f32 %v2324_v4, %v133_v8 }
  0x49   :  { %v2327_v11 = vld [vmem:[%s4063_s0 + $0xe2] ss:$8 sm:$0x3]  ;;  %v2329_v12 = vld [vmem:[%s4063_s0 + $0x3] ss:$8 sm:$0x3]  ;;  %v182_v41 = vadd.f32 %v2325_v5, %v134_v9  ;;  %v183_v44 = vadd.f32 %v2326_v10, %v135_v14 }
  0x4a   :  { %v2330_v13 = vld [vmem:[%s4063_s0 + $0x13] ss:$8 sm:$0x3]  ;;  %v2328_v16 = vld [vmem:[%s4063_s0 + $0xf2] ss:$8 sm:$0x3]  ;;  %v184_v45 = vadd.f32 %v2327_v11, %v136_v15  ;;  %v218_v47 = vadd.f32 %v2329_v12, %v170_v17 }
  0x4b   :  { %v2331_v19 = vld [vmem:[%s4063_s0 + $0x23] ss:$8 sm:$0x3]  ;;  %v2332_v20 = vld [vmem:[%s4063_s0 + $0x33] ss:$8 sm:$0x3]  ;;  %v219_v48 = vadd.f32 %v2330_v13, %v171_v18  ;;  %v185_v51 = vadd.f32 %v2328_v16, %v137_v22 }
  0x4c   :  { %v2333_v21 = vld [vmem:[%s4063_s0 + $0x43] ss:$8 sm:$0x3]  ;;  %v2334_v26 = vld [vmem:[%s4063_s0 + $0x53] ss:$8 sm:$0x3]  ;;  %v220_v52 = vadd.f32 %v2331_v19, %v172_v23  ;;  %v221_v53 = vadd.f32 %v2332_v20, %v173_v24 }
  0x4d   :  { %v2335_v27 = vld [vmem:[%s4063_s0 + $0x63] ss:$8 sm:$0x3]  ;;  %v2336_v28 = vld [vmem:[%s4063_s0 + $0x73] ss:$8 sm:$0x3]  ;;  %v222_v54 = vadd.f32 %v2333_v21, %v174_v25  ;;  %v223_v57 = vadd.f32 %v2334_v26, %v175_v30 }
  0x4e   :  { %v2337_v29 = vld [vmem:[%s4063_s0 + $0x83] ss:$8 sm:$0x3]  ;;  %v2338_v34 = vld [vmem:[%s4063_s0 + $0x93] ss:$8 sm:$0x3]  ;;  %v224_v58 = vadd.f32 %v2335_v27, %v176_v31  ;;  %v225_v59 = vadd.f32 %v2336_v28, %v177_v32 }
  0x4f   :  { %v2339_v35 = vld [vmem:[%s4063_s0 + $0xa3] ss:$8 sm:$0x3]  ;;  %v2340_v36 = vld [vmem:[%s4063_s0 + $0xb3] ss:$8 sm:$0x3]  ;;  %v226_v60 = vadd.f32 %v2337_v29, %v178_v33  ;;  %v227_v63 = vadd.f32 %v2338_v34, %v179_v38 }
  0x50   :  { %v2341_v37 = vld [vmem:[%s4063_s0 + $0xc3] ss:$8 sm:$0x3]  ;;  %v2342_v42 = vld [vmem:[%s4063_s0 + $0xd3] ss:$8 sm:$0x3]  ;;  %v228_v0 = vadd.f32 %v2339_v35, %v180_v39  ;;  %v229_v1 = vadd.f32 %v2340_v36, %v181_v40 }
  0x51   :  { %v2343_v43 = vld [vmem:[%s4063_s0 + $0xe3] ss:$8 sm:$0x3]  ;;  %v2344_v46 = vld [vmem:[%s4063_s0 + $0xf3] ss:$8 sm:$0x3]  ;;  %v230_v2 = vadd.f32 %v2341_v37, %v182_v41  ;;  %v231_v5 = vadd.f32 %v2342_v42, %v183_v44 }
  0x52   :  { %v2345_v49 = vld [vmem:[%s4063_s0 + $0x4] ss:$8 sm:$0x3]  ;;  %v2346_v50 = vld [vmem:[%s4063_s0 + $0x14] ss:$8 sm:$0x3]  ;;  %v232_v6 = vadd.f32 %v2343_v43, %v184_v45  ;;  %v233_v11 = vadd.f32 %v2344_v46, %v185_v51 }
  0x53   :  { %v2347_v55 = vld [vmem:[%s4063_s0 + $0x24] ss:$8 sm:$0x3]  ;;  %v2348_v56 = vld [vmem:[%s4063_s0 + $0x34] ss:$8 sm:$0x3]  ;;  %v266_v9 = vadd.f32 %v2345_v49, %v218_v47  ;;  %v267_v10 = vadd.f32 %v2346_v50, %v219_v48 }
  0x54   :  { %v2349_v61 = vld [vmem:[%s4063_s0 + $0x44] ss:$8 sm:$0x3]  ;;  %v2350_v62 = vld [vmem:[%s4063_s0 + $0x54] ss:$8 sm:$0x3]  ;;  %v268_v14 = vadd.f32 %v2347_v55, %v220_v52  ;;  %v269_v15 = vadd.f32 %v2348_v56, %v221_v53 }
  0x55   :  { %v2351_v3 = vld [vmem:[%s4063_s0 + $0x64] ss:$8 sm:$0x3]  ;;  %v2352_v4 = vld [vmem:[%s4063_s0 + $0x74] ss:$8 sm:$0x3]  ;;  %v270_v16 = vadd.f32 %v2349_v61, %v222_v54  ;;  %v271_v19 = vadd.f32 %v2350_v62, %v223_v57 }
  0x56   :  { %v2353_v7 = vld [vmem:[%s4063_s0 + $0x84] ss:$8 sm:$0x3]  ;;  %v2354_v8 = vld [vmem:[%s4063_s0 + $0x94] ss:$8 sm:$0x3]  ;;  %v272_v20 = vadd.f32 %v2351_v3, %v224_v58  ;;  %v273_v21 = vadd.f32 %v2352_v4, %v225_v59 }
  0x57   :  { %v2355_v12 = vld [vmem:[%s4063_s0 + $0xa4] ss:$8 sm:$0x3]  ;;  %v2356_v13 = vld [vmem:[%s4063_s0 + $0xb4] ss:$8 sm:$0x3]  ;;  %v274_v22 = vadd.f32 %v2353_v7, %v226_v60  ;;  %v275_v25 = vadd.f32 %v2354_v8, %v227_v63 }
  0x58   :  { %v2357_v17 = vld [vmem:[%s4063_s0 + $0xc4] ss:$8 sm:$0x3]  ;;  %v2358_v18 = vld [vmem:[%s4063_s0 + $0xd4] ss:$8 sm:$0x3]  ;;  %v276_v26 = vadd.f32 %v2355_v12, %v228_v0  ;;  %v277_v27 = vadd.f32 %v2356_v13, %v229_v1 }
  0x59   :  { %v2359_v23 = vld [vmem:[%s4063_s0 + $0xe4] ss:$8 sm:$0x3]  ;;  %v2360_v24 = vld [vmem:[%s4063_s0 + $0xf4] ss:$8 sm:$0x3]  ;;  %v278_v28 = vadd.f32 %v2357_v17, %v230_v2  ;;  %v279_v29 = vadd.f32 %v2358_v18, %v231_v5 }
  0x5a   :  { %v280_v30 = vadd.f32 %v2359_v23, %v232_v6  ;;  %v3737_v31 = vmul.f32 0.2, %v266_v9  ;;  %v3739_v32 = vmul.f32 0.2, %v267_v10  ;;  %v281_v33 = vadd.f32 %v2360_v24, %v233_v11 }
  0x5b   :  { %v3741_v34 = vmul.f32 0.2, %v268_v14  ;;  %v3743_v35 = vmul.f32 0.2, %v269_v15  ;;  %v3745_v36 = vmul.f32 0.2, %v270_v16 }
  0x5c   :  { %v3747_v37 = vmul.f32 0.2, %v271_v19  ;;  %v3749_v38 = vmul.f32 0.2, %v272_v20  ;;  %v3751_v39 = vmul.f32 0.2, %v273_v21 }
  0x5d   :  { %v3753_v40 = vmul.f32 0.2, %v274_v22  ;;  %v3755_v41 = vmul.f32 0.2, %v275_v25  ;;  %v3757_v42 = vmul.f32 0.2, %v276_v26 }
  0x5e   :  { %v3759_v43 = vmul.f32 0.2, %v277_v27  ;;  %v3761_v44 = vmul.f32 0.2, %v278_v28  ;;  %v3763_v45 = vmul.f32 0.2, %v279_v29 }
  0x5f   :  { %v3765_v46 = vmul.f32 0.2, %v280_v30  ;;  %v3767_v47 = vmul.f32 0.2, %v281_v33  ;;  %v314_v48 = vperm.slane %v3737_v31, 0  ;;  %v316_v49 = vperm.slane %v3739_v32, 0 }
  0x60   :  { %v318_v50 = vperm.slane %v3741_v34, 0  ;;  %v320_v51 = vperm.slane %v3743_v35, 0  ;;  %v322_v52 = vperm.slane %v3745_v36, 0  ;;  %v324_v53 = vperm.slane %v3747_v37, 0 }
  0x61   :  { %v326_v54 = vperm.slane %v3749_v38, 0  ;;  %v328_v55 = vperm.slane %v3751_v39, 0  ;;  %v330_v56 = vperm.slane %v3753_v40, 0  ;;  %v332_v57 = vperm.slane %v3755_v41, 0 }
  0x62   :  { %v334_v58 = vperm.slane %v3757_v42, 0  ;;  %v336_v59 = vperm.slane %v3759_v43, 0  ;;  %v338_v60 = vperm.slane %v3761_v44, 0  ;;  %v340_v61 = vperm.slane %v3763_v45, 0 }
  0x63   :  { %v342_v62 = vperm.slane %v3765_v46, 0  ;;  %v344_v63 = vperm.slane %v3767_v47, 0  ;;  %v378_v0 = vpack.c.bf16 %v314_v48, %v314_v48  ;;  %v380_v1 = vpack.c.bf16 %v316_v49, %v316_v49 }
  0x64   :  { %v382_v2 = vpack.c.bf16 %v318_v50, %v318_v50  ;;  %v384_v3 = vpack.c.bf16 %v320_v51, %v320_v51  ;;  %v386_v4 = vpack.c.bf16 %v322_v52, %v322_v52  ;;  %v388_v5 = vpack.c.bf16 %v324_v53, %v324_v53 }
  0x65   :  { %v390_v6 = vpack.c.bf16 %v326_v54, %v326_v54  ;;  %v392_v7 = vpack.c.bf16 %v328_v55, %v328_v55  ;;  %v394_v8 = vpack.c.bf16 %v330_v56, %v330_v56  ;;  %v396_v9 = vpack.c.bf16 %v332_v57, %v332_v57  ;;  %v2467_v54 = vld [vmem:[#allocation2 + $0xc8] sm:$0xf] }
  0x66   :  { %v398_v10 = vpack.c.bf16 %v334_v58, %v334_v58  ;;  %v400_v11 = vpack.c.bf16 %v336_v59, %v336_v59  ;;  %v402_v12 = vpack.c.bf16 %v338_v60, %v338_v60  ;;  %v404_v13 = vpack.c.bf16 %v340_v61, %v340_v61  ;;  %v3158_v55 = vld [vmem:[#allocation2 + $0xe4] sm:$0xf0] }
  0x67   :  { %v406_v14 = vpack.c.bf16 %v342_v62, %v342_v62  ;;  %v408_v15 = vpack.c.bf16 %v344_v63, %v344_v63  ;;  %v588_v16 = vunpack.c.l.b16 %v378_v0  ;;  %v590_v17 = vunpack.c.l.b16 %v380_v1  ;;  %v2723_v58 = vld [vmem:[#allocation2 + $0x2c8] sm:$0xf]  ;;  %v3154_v63 = vld [vmem:[#allocation2 + $0xcc] sm:$0xf] }
  0x68   :  { %v592_v18 = vunpack.c.l.b16 %v382_v2  ;;  %v594_v19 = vunpack.c.l.b16 %v384_v3  ;;  %v596_v20 = vunpack.c.l.b16 %v386_v4  ;;  %v598_v21 = vunpack.c.l.b16 %v388_v5  ;;  %v3222_v59 = vld [vmem:[#allocation2 + $0x2e4] sm:$0xf0]  ;;  %v2469_v4 = vld [vmem:[#allocation2 + $0xe8] sm:$0xf0] }
  0x69   :  { %v600_v22 = vunpack.c.l.b16 %v390_v6  ;;  %v602_v23 = vunpack.c.l.b16 %v392_v7  ;;  %v604_v24 = vunpack.c.l.b16 %v394_v8  ;;  %v606_v25 = vunpack.c.l.b16 %v396_v9  ;;  %v3218_v9 = vld [vmem:[#allocation2 + $0x2cc] sm:$0xf] }
  0x6a   :  { %v608_v26 = vunpack.c.l.b16 %v398_v10  ;;  %v610_v27 = vunpack.c.l.b16 %v400_v11  ;;  %v612_v28 = vunpack.c.l.b16 %v402_v12  ;;  %v614_v29 = vunpack.c.l.b16 %v404_v13  ;;  %v2725_v10 = vld [vmem:[#allocation2 + $0x2e8] sm:$0xf0] }
  0x6b   :  { %v616_v30 = vunpack.c.l.b16 %v406_v14  ;;  %v618_v33 = vunpack.c.l.b16 %v408_v15  ;;  %v620_v48 = vrot.slane %v590_v17, 7  ;;  %v623_v49 = vrot.slane %v592_v18, 6 }
  0x6c   :  { %v626_v50 = vrot.slane %v594_v19, 5  ;;  %v629_v52 = vrot.slane %v596_v20, 4  ;;  %v632_v53 = vrot.slane %v598_v21, 3  ;;  %v635_v57 = vrot.slane %v600_v22, 2 }
  0x6d   :  { %v622_v51 = vsel %vm621_vm0, %v620_v48, %v588_v16  ;;  %v638_v61 = vrot.slane %v602_v23, 1  ;;  %v655_v62 = vrot.slane %v606_v25, 7  ;;  %v657_v1 = vrot.slane %v608_v26, 6 }
  0x6e   :  { %v625_v56 = vsel %vm624_vm1, %v623_v49, %v622_v51  ;;  %v659_v2 = vrot.slane %v610_v27, 5  ;;  %v661_v3 = vrot.slane %v612_v28, 4  ;;  %v663_v7 = vrot.slane %v614_v29, 3 }
  0x6f   :  { %v628_v60 = vsel %vm627_vm2, %v626_v50, %v625_v56  ;;  %v656_v6 = vsel %vm621_vm0, %v655_v62, %v604_v24  ;;  %v665_v8 = vrot.slane %v616_v30, 2  ;;  %v667_v13 = vrot.slane %v618_v33, 1 }
  0x70   :  { %v631_v0 = vsel %vm630_vm3, %v629_v52, %v628_v60  ;;  %v658_v12 = vsel %vm624_vm1, %v657_v1, %v656_v6  ;;  %v2468_v14 = vor.u32 %v3158_v55, %v2467_v54  ;;  %v2724_v17 = vor.u32 %v3222_v59, %v2723_v58 }
  0x71   :  { %v634_v5 = vsel %vm633_vm4, %v632_v53, %v631_v0  ;;  %v660_v16 = vsel %vm627_vm2, %v659_v2, %v658_v12  ;;  %v2472_v18 = vor.u32 %v3154_v63, %v2469_v4  ;;  %v2728_v20 = vor.u32 %v3218_v9, %v2725_v10  ;;  %v2435_v10 = vld [vmem:[#allocation2 + $0x88] sm:$0xf] }
  0x72   :  { %v637_v11 = vsel %vm636_vm5, %v635_v57, %v634_v5  ;;  %v662_v19 = vsel %vm630_vm3, %v661_v3, %v660_v16  ;;  %1387 = vmatpush.bf16.msrb.mxu0 %v2468_v14  ;;  %v315_v21 = vperm.slane %v3737_v31, 1  ;;  %v317_v22 = vperm.slane %v3739_v32, 1  ;;  %1401 = vmatpush.bf16.msrb.mxu1 %v2724_v17  ;;  %v2691_v16 = vld [vmem:[#allocation2 + $0x288] sm:$0xf] }
  0x73   :  { %v640_v15 = vsel %vm639_vm6, %v638_v61, %v637_v11  ;;  %v664_v23 = vsel %vm633_vm4, %v663_v7, %v662_v19  ;;  %1415 = vmatpush.bf16.msrb.mxu2 %v2472_v18  ;;  %v319_v24 = vperm.slane %v3741_v34, 1  ;;  %v321_v25 = vperm.slane %v3743_v35, 1  ;;  %1429 = vmatpush.bf16.msrb.mxu3 %v2728_v20  ;;  %v3150_v11 = vld [vmem:[#allocation2 + $0xa4] sm:$0xf0]  ;;  %v3146_v18 = vld [vmem:[#allocation2 + $0x8c] sm:$0xf] }
  0x74   :  { %v323_v26 = vperm.slane %v3745_v36, 1  ;;  %v666_v27 = vsel %vm636_vm5, %v665_v8, %v664_v23  ;;  %v325_v28 = vperm.slane %v3747_v37, 1  ;;  %v327_v29 = vperm.slane %v3749_v38, 1  ;;  %v3214_v17 = vld [vmem:[#allocation2 + $0x2a4] sm:$0xf0] }
  0x75   :  { %v329_v31 = vperm.slane %v3751_v39, 1  ;;  %v668_v32 = vsel %vm639_vm6, %v667_v13, %v666_v27  ;;  %v331_v30 = vperm.slane %v3753_v40, 1  ;;  %v333_v33 = vperm.slane %v3755_v41, 1  ;;  %v2437_v19 = vld [vmem:[#allocation2 + $0xa8] sm:$0xf0] }
  0x76   :  { %v335_v34 = vperm.slane %v3757_v42, 1  ;;  %v3810_v35 = vpack.c.b16 %v668_v32, %v640_v15  ;;  %v337_v36 = vperm.slane %v3759_v43, 1  ;;  %v339_v48 = vperm.slane %v3761_v44, 1 }
  0x77   :  { %v341_v37 = vperm.slane %v3763_v45, 1  ;;  %v343_v38 = vperm.slane %v3765_v46, 1  ;;  %v345_v39 = vperm.slane %v3767_v47, 1  ;;  %v379_v49 = vpack.c.bf16 %v315_v21, %v315_v21 }
  0x78   :  { %v381_v50 = vpack.c.bf16 %v317_v22, %v317_v22  ;;  %1335 = vmatmul.bf16.vlgmr.msra.gmra.mxu0 %v3810_v35  ;;  %1363 = vmatmul.bf16.vlgmr.msra.gmra.mxu2 %v3810_v35  ;;  %v383_v40 = vpack.c.bf16 %v319_v24, %v319_v24  ;;  %v385_v41 = vpack.c.bf16 %v321_v25, %v321_v25  ;;  %v3210_v24 = vld [vmem:[#allocation2 + $0x28c] sm:$0xf] }
  0x79   :  { %v387_v42 = vpack.c.bf16 %v323_v26, %v323_v26  ;;  %v389_v51 = vpack.c.bf16 %v325_v28, %v325_v28  ;;  %v391_v52 = vpack.c.bf16 %v327_v29, %v327_v29  ;;  %v393_v43 = vpack.c.bf16 %v329_v31, %v329_v31  ;;  %v2693_v29 = vld [vmem:[#allocation2 + $0x2a8] sm:$0xf0] }
  0x7a   :  { %v395_v53 = vpack.c.bf16 %v331_v30, %v331_v30  ;;  %v397_v44 = vpack.c.bf16 %v333_v33, %v333_v33  ;;  %v399_v54 = vpack.c.bf16 %v335_v34, %v335_v34  ;;  %v401_v45 = vpack.c.bf16 %v337_v36, %v337_v36  ;;  %v2403_v34 = vld [vmem:[#allocation2 + $0x48] sm:$0xf] }
  0x7b   :  { %v403_v55 = vpack.c.bf16 %v339_v48, %v339_v48  ;;  %v405_v46 = vpack.c.bf16 %v341_v37, %v341_v37  ;;  %v407_v56 = vpack.c.bf16 %v343_v38, %v343_v38  ;;  %v409_v47 = vpack.c.bf16 %v345_v39, %v345_v39  ;;  %v3142_v36 = vld [vmem:[#allocation2 + $0x64] sm:$0xf0] }
  0x7c   :  { %v589_v57 = vunpack.c.l.b16 %v379_v49  ;;  %v591_v58 = vunpack.c.l.b16 %v381_v50  ;;  %v593_v59 = vunpack.c.l.b16 %v383_v40  ;;  %v595_v60 = vunpack.c.l.b16 %v385_v41  ;;  %v2659_v49 = vld [vmem:[#allocation2 + $0x248] sm:$0xf] }
  0x7d   :  { %v597_v61 = vunpack.c.l.b16 %v387_v42  ;;  %v599_v62 = vunpack.c.l.b16 %v389_v51  ;;  %v601_v63 = vunpack.c.l.b16 %v391_v52  ;;  %v603_v0 = vunpack.c.l.b16 %v393_v43  ;;  %v3206_v50 = vld [vmem:[#allocation2 + $0x264] sm:$0xf0]  ;;  %v3138_v52 = vld [vmem:[#allocation2 + $0x4c] sm:$0xf] }
  0x7e   :  { %v605_v1 = vunpack.c.l.b16 %v395_v53  ;;  %v607_v2 = vunpack.c.l.b16 %v397_v44  ;;  %v609_v3 = vunpack.c.l.b16 %v399_v54  ;;  %v611_v4 = vunpack.c.l.b16 %v401_v45  ;;  %v2405_v43 = vld [vmem:[#allocation2 + $0x68] sm:$0xf0] }
  0x7f   :  { %v613_v5 = vunpack.c.l.b16 %v403_v55  ;;  %v615_v6 = vunpack.c.l.b16 %v405_v46  ;;  %v617_v7 = vunpack.c.l.b16 %v407_v56  ;;  %v619_v8 = vunpack.c.l.b16 %v409_v47  ;;  %v3202_v53 = vld [vmem:[#allocation2 + $0x24c] sm:$0xf]  ;;  %v2371_v56 = vld [vmem:[#allocation2 + $0x8] sm:$0xf] }
  0x80   :  { %v641_v9 = vrot.slane %v591_v58, 7  ;;  %v643_v12 = vrot.slane %v593_v59, 6  ;;  %v645_v13 = vrot.slane %v595_v60, 5  ;;  %v647_v14 = vrot.slane %v597_v61, 4  ;;  %v2661_v46 = vld [vmem:[#allocation2 + $0x268] sm:$0xf0] }
  0x81   :  { %v649_v15 = vrot.slane %v599_v62, 3  ;;  %v651_v21 = vrot.slane %v601_v63, 2  ;;  %v653_v22 = vrot.slane %v603_v0, 1  ;;  %v669_v23 = vrot.slane %v607_v2, 7  ;;  %v3134_v47 = vld [vmem:[#allocation2 + $0x24] sm:$0xf0] }
  0x82   :  { %v642_v20 = vsel %vm621_vm0, %v641_v9, %v589_v57  ;;  %v671_v26 = vrot.slane %v609_v3, 6  ;;  %v673_v27 = vrot.slane %v611_v4, 5  ;;  %v675_v28 = vrot.slane %v613_v5, 4  ;;  %v2627_v60 = vld [vmem:[#allocation2 + $0x208] sm:$0xf] }
  0x83   :  { %v644_v25 = vsel %vm624_vm1, %v643_v12, %v642_v20  ;;  %v670_v32 = vsel %vm621_vm0, %v669_v23, %v605_v1  ;;  %v677_v30 = vrot.slane %v615_v6, 3  ;;  %v679_v33 = vrot.slane %v617_v7, 2  ;;  %v3198_v61 = vld [vmem:[#allocation2 + $0x224] sm:$0xf0]  ;;  %v3130_v62 = vld [vmem:[#allocation2 + $0xc] sm:$0xf] }
  0x84   :  { %v646_v31 = vsel %vm627_vm2, %v645_v13, %v644_v25  ;;  %v672_v37 = vsel %vm624_vm1, %v671_v26, %v670_v32  ;;  %v681_v38 = vrot.slane %v619_v8, 1  ;;  %v2436_v39 = vor.u32 %v3150_v11, %v2435_v10  ;;  %v2373_v1 = vld [vmem:[#allocation2 + $0x28] sm:$0xf0]  ;;  %v2603_v3 = vld [vmem:[#allocation2 + $0x1d0] sm:$0xf] }
  0x85   :  { %v648_v48 = vsel %vm630_vm3, %v647_v14, %v646_v31  ;;  %v674_v41 = vsel %vm627_vm2, %v673_v27, %v672_v37  ;;  %v2692_v42 = vor.u32 %v3214_v17, %v2691_v16  ;;  %v2440_v51 = vor.u32 %v3146_v18, %v2437_v19  ;;  %v3194_v2 = vld [vmem:[#allocation2 + $0x20c] sm:$0xf]  ;;  %v3191_v6 = vld [vmem:[#allocation2 + $0x1ec] sm:$0xf0]  ;;  %v3187_v12 = vld [vmem:[#allocation2 + $0x1d4] sm:$0xf] }
  0x86   :  { %v650_v40 = vsel %vm633_vm4, %v649_v15, %v648_v48  ;;  %v676_v54 = vsel %vm630_vm3, %v675_v28, %v674_v41  ;;  %1388 = vmatpush.bf16.msrb.mxu0 %v2436_v39  ;;  %v2696_v45 = vor.u32 %v3210_v24, %v2693_v29  ;;  %v2404_v55 = vor.u32 %v3142_v36, %v2403_v34  ;;  %v2859_v7 = vld [vmem:[#allocation2 + $0x3d0] sm:$0xf]  ;;  %v2629_v11 = vld [vmem:[#allocation2 + $0x228] sm:$0xf0]  ;;  %v2605_v13 = vld [vmem:[#allocation2 + $0x1f0] sm:$0xf0] }
  0x87   :  { %v652_v44 = vsel %vm636_vm5, %v651_v21, %v650_v40  ;;  %v678_v58 = vsel %vm633_vm4, %v677_v30, %v676_v54  ;;  %1402 = vmatpush.bf16.msrb.mxu1 %v2692_v42  ;;  %1416 = vmatpush.bf16.msrb.mxu2 %v2440_v51  ;;  %v2660_v59 = vor.u32 %v3206_v50, %v2659_v49  ;;  %v3255_v8 = vld [vmem:[#allocation2 + $0x3ec] sm:$0xf0]  ;;  %v3251_v16 = vld [vmem:[#allocation2 + $0x3d4] sm:$0xf] }
  0x88   :  { %v654_v57 = vsel %vm639_vm6, %v653_v22, %v652_v44  ;;  %v680_v63 = vsel %vm636_vm5, %v679_v33, %v678_v58  ;;  %1430 = vmatpush.bf16.msrb.mxu3 %v2696_v45  ;;  %v2408_v0 = vor.u32 %v3138_v52, %v2405_v43  ;;  %v2664_v5 = vor.u32 %v3202_v53, %v2661_v46  ;;  %v2861_v17 = vld [vmem:[#allocation2 + $0x3f0] sm:$0xf0]  ;;  %v2571_v20 = vld [vmem:[#allocation2 + $0x190] sm:$0xf] }
  0x89   :  { %v682_v4 = vsel %vm639_vm6, %v681_v38, %v680_v63  ;;  %v2372_v10 = vor.u32 %v3134_v47, %v2371_v56  ;;  %v2628_v14 = vor.u32 %v3198_v61, %v2627_v60  ;;  %v2376_v15 = vor.u32 %v3130_v62, %v2373_v1  ;;  %v3183_v23 = vld [vmem:[#allocation2 + $0x1ac] sm:$0xf0]  ;;  %v3179_v27 = vld [vmem:[#allocation2 + $0x194] sm:$0xf] }
  0x8a   :  { %v3833_v9 = vpack.c.b16 %v682_v4, %v654_v57  ;;  %1389 = vmatpush.bf16.msrb.mxu0 %v2404_v55  ;;  %v2604_v18 = vor.u32 %v3191_v6, %v2603_v3  ;;  %v2860_v19 = vor.u32 %v3255_v8, %v2859_v7  ;;  %v2632_v21 = vor.u32 %v3194_v2, %v2629_v11  ;;  %v2827_v24 = vld [vmem:[#allocation2 + $0x390] sm:$0xf]  ;;  %v2573_v28 = vld [vmem:[#allocation2 + $0x1b0] sm:$0xf0] }
  0x8b   :  { %1403 = vmatpush.bf16.msrb.mxu1 %v2660_v59  ;;  %1417 = vmatpush.bf16.msrb.mxu2 %v2408_v0  ;;  %v2608_v22 = vor.u32 %v3187_v12, %v2605_v13  ;;  %v3247_v25 = vld [vmem:[#allocation2 + $0x3ac] sm:$0xf0]  ;;  %v2864_v26 = vor.u32 %v3251_v16, %v2861_v17  ;;  %v3243_v29 = vld [vmem:[#allocation2 + $0x394] sm:$0xf]  ;;  %v2572_v32 = vor.u32 %v3183_v23, %v2571_v20 }
  0x8c   :  { %1349 = vmatmul.bf16.vlgmr.msra.gmra.mxu1 %v3833_v9  ;;  %1377 = vmatmul.bf16.vlgmr.msra.gmra.mxu3 %v3833_v9  ;;  %v2829_v31 = vld [vmem:[#allocation2 + $0x3b0] sm:$0xf0]  ;;  %v2828_v30 = vor.u32 %v3247_v25, %v2827_v24  ;;  %v2539_v33 = vld [vmem:[#allocation2 + $0x150] sm:$0xf]  ;;  %v2576_v34 = vor.u32 %v3179_v27, %v2573_v28 }
  0x8d   :  { %1431 = vmatpush.bf16.msrb.mxu3 %v2664_v5  ;;  %v3175_v36 = vld [vmem:[#allocation2 + $0x16c] sm:$0xf0]  ;;  %v2832_v38 = vor.u32 %v3243_v29, %v2829_v31  ;;  %v3171_v39 = vld [vmem:[#allocation2 + $0x154] sm:$0xf] }
  0x8e   :  { %1390 = vmatpush.bf16.msrb.mxu0 %v2372_v10  ;;  %v2795_v48 = vld [vmem:[#allocation2 + $0x350] sm:$0xf]  ;;  %v2541_v49 = vld [vmem:[#allocation2 + $0x170] sm:$0xf0]  ;;  %v2540_v41 = vor.u32 %v3175_v36, %v2539_v33 }
  0x8f   :  { %1404 = vmatpush.bf16.msrb.mxu1 %v2628_v14  ;;  %1418 = vmatpush.bf16.msrb.mxu2 %v2376_v15  ;;  %v3239_v37 = vld [vmem:[#allocation2 + $0x36c] sm:$0xf0]  ;;  %v3235_v50 = vld [vmem:[#allocation2 + $0x354] sm:$0xf]  ;;  %v2544_v51 = vor.u32 %v3171_v39, %v2541_v49 }
  0x90   :  { %v2797_v40 = vld [vmem:[#allocation2 + $0x370] sm:$0xf0]  ;;  %v2796_v42 = vor.u32 %v3239_v37, %v2795_v48  ;;  %v2507_v52 = vld [vmem:[#allocation2 + $0x110] sm:$0xf] }
  0x91   :  { %1432 = vmatpush.bf16.msrb.mxu3 %v2632_v21  ;;  %1391 = vmatmul.bf16.vlgmr.msrb.gmra.mxu0 %v3810_v35  ;;  %v3167_v43 = vld [vmem:[#allocation2 + $0x12c] sm:$0xf0]  ;;  %v2800_v53 = vor.u32 %v3235_v50, %v2797_v40  ;;  %v3163_v45 = vld [vmem:[#allocation2 + $0x114] sm:$0xf]  ;;  %v2611_v50 = vld [vmem:[#allocation2 + $0x1d8] sm:$0xf] }
  0x92   :  { %1439 = vmatpush.bf16.msra.mxu0 %v2604_v18  ;;  %1419 = vmatmul.bf16.vlgmr.msrb.gmra.mxu2 %v3810_v35  ;;  %v2763_v44 = vld [vmem:[#allocation2 + $0x310] sm:$0xf]  ;;  %v2509_v55 = vld [vmem:[#allocation2 + $0x130] sm:$0xf0]  ;;  %v2508_v47 = vor.u32 %v3167_v43, %v2507_v52  ;;  %v3192_v40 = vld [vmem:[#allocation2 + $0x1f4] sm:$0xf0] }
  0x93   :  { %1453 = vmatpush.bf16.msra.mxu1 %v2860_v19  ;;  %1467 = vmatpush.bf16.msra.mxu2 %v2608_v22  ;;  %v3231_v54 = vld [vmem:[#allocation2 + $0x32c] sm:$0xf0]  ;;  %v3227_v46 = vld [vmem:[#allocation2 + $0x314] sm:$0xf]  ;;  %v2512_v60 = vor.u32 %v3163_v45, %v2509_v55 }
  0x94   :  { %v2765_v56 = vld [vmem:[#allocation2 + $0x330] sm:$0xf0]  ;;  %v2764_v57 = vor.u32 %v3231_v54, %v2763_v44  ;;  %v2475_v58 = vld [vmem:[#allocation2 + $0xd0] sm:$0xf]  ;;  %v3252_v44 = vld [vmem:[#allocation2 + $0x3dc] sm:$0xf] }
  0x95   :  { %1481 = vmatpush.bf16.msra.mxu3 %v2864_v26  ;;  %v3159_v59 = vld [vmem:[#allocation2 + $0xec] sm:$0xf0]  ;;  %v2768_v61 = vor.u32 %v3227_v46, %v2765_v56  ;;  %v3155_v0 = vld [vmem:[#allocation2 + $0xd4] sm:$0xf]  ;;  %v2869_v54 = vld [vmem:[#allocation2 + $0x3f8] sm:$0xf0]  ;;  %v2612_v46 = vor.u32 %v3192_v40, %v2611_v50 }
  0x96   :  { %1440 = vmatpush.bf16.msra.mxu0 %v2572_v32  ;;  %v2731_v62 = vld [vmem:[#allocation2 + $0x2d0] sm:$0xf]  ;;  %v2477_v1 = vld [vmem:[#allocation2 + $0xf0] sm:$0xf0]  ;;  %v2476_v4 = vor.u32 %v3159_v59, %v2475_v58  ;;  %v2872_v59 = vor.u32 %v3252_v44, %v2869_v54  ;;  %v2451_v50 = vld [vmem:[#allocation2 + $0x98] sm:$0xf] }
  0x97   :  { %1454 = vmatpush.bf16.msra.mxu1 %v2828_v30  ;;  %1468 = vmatpush.bf16.msra.mxu2 %v2576_v34  ;;  %v3223_v63 = vld [vmem:[#allocation2 + $0x2ec] sm:$0xf0]  ;;  %v3219_v2 = vld [vmem:[#allocation2 + $0x2d4] sm:$0xf]  ;;  %v2480_v8 = vor.u32 %v3155_v0, %v2477_v1  ;;  %v3244_v0 = vld [vmem:[#allocation2 + $0x39c] sm:$0xf] }
  0x98   :  { %v2733_v3 = vld [vmem:[#allocation2 + $0x2f0] sm:$0xf0]  ;;  %v2732_v5 = vor.u32 %v3223_v63, %v2731_v62  ;;  %v2443_v6 = vld [vmem:[#allocation2 + $0x90] sm:$0xf]  ;;  %v3180_v62 = vld [vmem:[#allocation2 + $0x19c] sm:$0xf] }
  0x99   :  { %1482 = vmatpush.bf16.msra.mxu3 %v2832_v38  ;;  %v3151_v7 = vld [vmem:[#allocation2 + $0xac] sm:$0xf0]  ;;  %v2736_v10 = vor.u32 %v3219_v2, %v2733_v3  ;;  %v3147_v13 = vld [vmem:[#allocation2 + $0x94] sm:$0xf]  ;;  %v2581_v63 = vld [vmem:[#allocation2 + $0x1b8] sm:$0xf0] }
  0x9a   :  { %1441 = vmatpush.bf16.msra.mxu0 %v2540_v41  ;;  %v2699_v11 = vld [vmem:[#allocation2 + $0x290] sm:$0xf]  ;;  %v2445_v14 = vld [vmem:[#allocation2 + $0xb0] sm:$0xf0]  ;;  %v2444_v17 = vor.u32 %v3151_v7, %v2443_v6  ;;  %v2867_v41 = vld [vmem:[#allocation2 + $0x3d8] sm:$0xf]  ;;  %v2584_v6 = vor.u32 %v3180_v62, %v2581_v63 }
  0x9b   :  { %1455 = vmatpush.bf16.msra.mxu1 %v2796_v42  ;;  %1469 = vmatpush.bf16.msra.mxu2 %v2544_v51  ;;  %v3215_v12 = vld [vmem:[#allocation2 + $0x2ac] sm:$0xf0]  ;;  %v3211_v15 = vld [vmem:[#allocation2 + $0x294] sm:$0xf]  ;;  %v2448_v21 = vor.u32 %v3147_v13, %v2445_v14  ;;  %v3256_v42 = vld [vmem:[#allocation2 + $0x3f4] sm:$0xf0] }
  0x9c   :  { %1405 = vmatmul.bf16.vlgmr.msrb.gmra.mxu1 %v3833_v9  ;;  %1433 = vmatmul.bf16.vlgmr.msrb.gmra.mxu3 %v3833_v9  ;;  %v2701_v16 = vld [vmem:[#allocation2 + $0x2b0] sm:$0xf0]  ;;  %v2700_v18 = vor.u32 %v3215_v12, %v2699_v11  ;;  %v2411_v19 = vld [vmem:[#allocation2 + $0x50] sm:$0xf]  ;;  %v3188_v51 = vld [vmem:[#allocation2 + $0x1dc] sm:$0xf]  ;;  %v2868_v56 = vor.u32 %v3256_v42, %v2867_v41 }
  0x9d   :  { %1483 = vmatpush.bf16.msra.mxu3 %v2800_v53  ;;  %v3143_v20 = vld [vmem:[#allocation2 + $0x6c] sm:$0xf0]  ;;  %v2704_v22 = vor.u32 %v3211_v15, %v2701_v16  ;;  %v3139_v25 = vld [vmem:[#allocation2 + $0x54] sm:$0xf]  ;;  %v2613_v53 = vld [vmem:[#allocation2 + $0x1f8] sm:$0xf0] }
  0x9e   :  { %1442 = vmatpush.bf16.msra.mxu0 %v2508_v47  ;;  %v2667_v23 = vld [vmem:[#allocation2 + $0x250] sm:$0xf]  ;;  %v2413_v26 = vld [vmem:[#allocation2 + $0x70] sm:$0xf0]  ;;  %v2412_v31 = vor.u32 %v3143_v20, %v2411_v19  ;;  %v2579_v47 = vld [vmem:[#allocation2 + $0x198] sm:$0xf]  ;;  %v2616_v58 = vor.u32 %v3188_v51, %v2613_v53 }
  0x9f   :  { %1456 = vmatpush.bf16.msra.mxu1 %v2764_v57  ;;  %1470 = vmatpush.bf16.msra.mxu2 %v2512_v60  ;;  %v3207_v24 = vld [vmem:[#allocation2 + $0x26c] sm:$0xf0]  ;;  %v3203_v27 = vld [vmem:[#allocation2 + $0x254] sm:$0xf]  ;;  %v2416_v36 = vor.u32 %v3139_v25, %v2413_v26  ;;  %v3184_v57 = vld [vmem:[#allocation2 + $0x1b4] sm:$0xf0] }
  0xa0   :  { %v2669_v28 = vld [vmem:[#allocation2 + $0x270] sm:$0xf0]  ;;  %v2379_v29 = vld [vmem:[#allocation2 + $0x10] sm:$0xf]  ;;  %v2668_v32 = vor.u32 %v3207_v24, %v2667_v23  ;;  %v2835_v60 = vld [vmem:[#allocation2 + $0x398] sm:$0xf]  ;;  %v2580_v2 = vor.u32 %v3184_v57, %v2579_v47 }
  0xa1   :  { %1484 = vmatpush.bf16.msra.mxu3 %v2768_v61  ;;  %v3135_v30 = vld [vmem:[#allocation2 + $0x2c] sm:$0xf0]  ;;  %v2672_v48 = vor.u32 %v3203_v27, %v2669_v28  ;;  %v3131_v37 = vld [vmem:[#allocation2 + $0x14] sm:$0xf]  ;;  %v3248_v61 = vld [vmem:[#allocation2 + $0x3b4] sm:$0xf0] }
  0xa2   :  { %1443 = vmatpush.bf16.msra.mxu0 %v2476_v4  ;;  %v2635_v33 = vld [vmem:[#allocation2 + $0x210] sm:$0xf]  ;;  %v2381_v38 = vld [vmem:[#allocation2 + $0x30] sm:$0xf0]  ;;  %v2380_v52 = vor.u32 %v3135_v30, %v2379_v29  ;;  %v2837_v1 = vld [vmem:[#allocation2 + $0x3b8] sm:$0xf0]  ;;  %v2836_v3 = vor.u32 %v3248_v61, %v2835_v60 }
  0xa3   :  { %1457 = vmatpush.bf16.msra.mxu1 %v2732_v5  ;;  %1471 = vmatpush.bf16.msra.mxu2 %v2480_v8  ;;  %v3199_v34 = vld [vmem:[#allocation2 + $0x22c] sm:$0xf0]  ;;  %v3195_v39 = vld [vmem:[#allocation2 + $0x214] sm:$0xf]  ;;  %v2384_v45 = vor.u32 %v3131_v37, %v2381_v38  ;;  %v2547_v4 = vld [vmem:[#allocation2 + $0x158] sm:$0xf]  ;;  %v2840_v7 = vor.u32 %v3244_v0, %v2837_v1 }
  0xa4   :  { %v2637_v49 = vld [vmem:[#allocation2 + $0x230] sm:$0xf0]  ;;  %v2636_v43 = vor.u32 %v3199_v34, %v2635_v33  ;;  %v3176_v5 = vld [vmem:[#allocation2 + $0x174] sm:$0xf0]  ;;  %v3172_v11 = vld [vmem:[#allocation2 + $0x15c] sm:$0xf] }
  0xa5   :  { %1485 = vmatpush.bf16.msra.mxu3 %v2736_v10  ;;  %v2640_v55 = vor.u32 %v3195_v39, %v2637_v49  ;;  %v2803_v8 = vld [vmem:[#allocation2 + $0x358] sm:$0xf]  ;;  %v2549_v12 = vld [vmem:[#allocation2 + $0x178] sm:$0xf0]  ;;  %v2548_v15 = vor.u32 %v3176_v5, %v2547_v4 }
  0xa6   :  { %1444 = vmatpush.bf16.msra.mxu0 %v2444_v17  ;;  %v3240_v10 = vld [vmem:[#allocation2 + $0x374] sm:$0xf0]  ;;  %v3236_v13 = vld [vmem:[#allocation2 + $0x35c] sm:$0xf]  ;;  %v2552_v19 = vor.u32 %v3172_v11, %v2549_v12 }
  0xa7   :  { %1458 = vmatpush.bf16.msra.mxu1 %v2700_v18  ;;  %1472 = vmatpush.bf16.msra.mxu2 %v2448_v21  ;;  %v2805_v14 = vld [vmem:[#allocation2 + $0x378] sm:$0xf0]  ;;  %v2804_v16 = vor.u32 %v3240_v10, %v2803_v8  ;;  %v2515_v17 = vld [vmem:[#allocation2 + $0x118] sm:$0xf] }
  0xa8   :  { %v3168_v18 = vld [vmem:[#allocation2 + $0x134] sm:$0xf0]  ;;  %v2808_v20 = vor.u32 %v3236_v13, %v2805_v14  ;;  %v3164_v23 = vld [vmem:[#allocation2 + $0x11c] sm:$0xf]  ;;  %v3099_v13 = vld [vmem:[#allocation5 + $0x1c0] sm:$0xf] }
  0xa9   :  { %1486 = vmatpush.bf16.msra.mxu3 %v2704_v22  ;;  %v2771_v21 = vld [vmem:[#allocation2 + $0x318] sm:$0xf]  ;;  %v2517_v24 = vld [vmem:[#allocation2 + $0x138] sm:$0xf0]  ;;  %v2516_v27 = vor.u32 %v3168_v18, %v2515_v17  ;;  %v3317_v14 = vld [vmem:[#allocation5 + $0x1dc] sm:$0xf0] }
  0xaa   :  { %1445 = vmatpush.bf16.msra.mxu0 %v2412_v31  ;;  %v3232_v22 = vld [vmem:[#allocation2 + $0x334] sm:$0xf0]  ;;  %v3228_v25 = vld [vmem:[#allocation2 + $0x31c] sm:$0xf]  ;;  %v3107_v17 = vld [vmem:[#allocation5 + $0x1c8] sm:$0xf] }
  0xab   :  { %1459 = vmatpush.bf16.msra.mxu1 %v2668_v32  ;;  %1473 = vmatpush.bf16.msra.mxu2 %v2416_v36  ;;  %v2773_v26 = vld [vmem:[#allocation2 + $0x338] sm:$0xf0]  ;;  %v2772_v28 = vor.u32 %v3232_v22, %v2771_v21  ;;  %v2483_v29 = vld [vmem:[#allocation2 + $0xd8] sm:$0xf]  ;;  %v2520_v32 = vor.u32 %v3164_v23, %v2517_v24  ;;  %v3314_v21 = vld [vmem:[#allocation5 + $0x1cc] sm:$0xf] }
  0xac   :  { %v3160_v31 = vld [vmem:[#allocation2 + $0xf4] sm:$0xf0]  ;;  %v2776_v30 = vor.u32 %v3228_v25, %v2773_v26  ;;  %v3156_v36 = vld [vmem:[#allocation2 + $0xdc] sm:$0xf]  ;;  %v3109_v22 = vld [vmem:[#allocation5 + $0x1e8] sm:$0xf0]  ;;  %v3100_v25 = vor.u32 %v3317_v14, %v3099_v13 }
  0xad   :  { %1487 = vmatpush.bf16.msra.mxu3 %v2672_v48  ;;  %v2739_v33 = vld [vmem:[#allocation2 + $0x2d8] sm:$0xf]  ;;  %v2485_v48 = vld [vmem:[#allocation2 + $0xf8] sm:$0xf0]  ;;  %v2484_v39 = vor.u32 %v3160_v31, %v2483_v29  ;;  %v3112_v31 = vor.u32 %v3314_v21, %v3109_v22 }
  0xae   :  { %1446 = vmatpush.bf16.msra.mxu0 %v2380_v52  ;;  %v3224_v34 = vld [vmem:[#allocation2 + $0x2f4] sm:$0xf0]  ;;  %v3220_v37 = vld [vmem:[#allocation2 + $0x2dc] sm:$0xf]  ;;  %v2488_v41 = vor.u32 %v3156_v36, %v2485_v48  ;;  %v3306_v36 = vld [vmem:[#allocation5 + $0x18c] sm:$0xf] }
  0xaf   :  { %1460 = vmatpush.bf16.msra.mxu1 %v2636_v43  ;;  %1474 = vmatpush.bf16.msra.mxu2 %v2384_v45  ;;  %v2741_v38 = vld [vmem:[#allocation2 + $0x2f8] sm:$0xf0]  ;;  %v2740_v49 = vor.u32 %v3224_v34, %v2739_v33  ;;  %v3152_v40 = vld [vmem:[#allocation2 + $0xb4] sm:$0xf0]  ;;  %v3075_v33 = vld [vmem:[#allocation5 + $0x188] sm:$0xf] }
  0xb0   :  { %v2744_v42 = vor.u32 %v3220_v37, %v2741_v38  ;;  %v2707_v51 = vld [vmem:[#allocation2 + $0x298] sm:$0xf]  ;;  %v3148_v43 = vld [vmem:[#allocation2 + $0x9c] sm:$0xf]  ;;  %v2452_v45 = vor.u32 %v3152_v40, %v2451_v50  ;;  %v3310_v34 = vld [vmem:[#allocation5 + $0x1a4] sm:$0xf0] }
  0xb1   :  { %1488 = vmatpush.bf16.msra.mxu3 %v2640_v55  ;;  %1447 = vmatmul.bf16.vlgmr.msra.gmra.mxu0 %v3810_v35  ;;  %v3216_v52 = vld [vmem:[#allocation2 + $0x2b4] sm:$0xf0]  ;;  %v2453_v53 = vld [vmem:[#allocation2 + $0xb8] sm:$0xf0]  ;;  %v3077_v48 = vld [vmem:[#allocation5 + $0x1a8] sm:$0xf0]  ;;  %v3076_v50 = vor.u32 %v3310_v34, %v3075_v33 }
  0xb2   :  { %1495 = vmatpush.bf16.msrb.mxu0 %v2612_v46  ;;  %1475 = vmatmul.bf16.vlgmr.msra.gmra.mxu2 %v3810_v35  ;;  %v3212_v44 = vld [vmem:[#allocation2 + $0x29c] sm:$0xf]  ;;  %v2708_v55 = vor.u32 %v3216_v52, %v2707_v51  ;;  %v2419_v46 = vld [vmem:[#allocation2 + $0x58] sm:$0xf]  ;;  %v2456_v47 = vor.u32 %v3148_v43, %v2453_v53  ;;  %v3080_v40 = vor.u32 %v3306_v36, %v3077_v48  ;;  %v3043_v51 = vld [vmem:[#allocation5 + $0x148] sm:$0xf] }
  0xb3   :  { %1509 = vmatpush.bf16.msrb.mxu1 %v2868_v56  ;;  %1523 = vmatpush.bf16.msrb.mxu2 %v2616_v58  ;;  %v2709_v54 = vld [vmem:[#allocation2 + $0x2b8] sm:$0xf0]  ;;  %v3144_v56 = vld [vmem:[#allocation2 + $0x74] sm:$0xf0]  ;;  %v3302_v52 = vld [vmem:[#allocation5 + $0x164] sm:$0xf0] }
  0xb4   :  { %1461 = vmatmul.bf16.vlgmr.msra.gmra.mxu1 %v3833_v9  ;;  %1489 = vmatmul.bf16.vlgmr.msra.gmra.mxu3 %v3833_v9  ;;  %v2712_v57 = vor.u32 %v3212_v44, %v2709_v54  ;;  %v2675_v58 = vld [vmem:[#allocation2 + $0x258] sm:$0xf]  ;;  %v3140_v60 = vld [vmem:[#allocation2 + $0x5c] sm:$0xf]  ;;  %v2420_v1 = vor.u32 %v3144_v56, %v2419_v46  ;;  %v3298_v43 = vld [vmem:[#allocation5 + $0x14c] sm:$0xf]  ;;  %v3044_v46 = vor.u32 %v3302_v52, %v3043_v51 }
  0xb5   :  { %1537 = vmatpush.bf16.msrb.mxu3 %v2872_v59  ;;  %v3208_v59 = vld [vmem:[#allocation2 + $0x274] sm:$0xf0]  ;;  %v2421_v61 = vld [vmem:[#allocation2 + $0x78] sm:$0xf0]  ;;  %v3045_v53 = vld [vmem:[#allocation5 + $0x168] sm:$0xf0] }
  0xb6   :  { %1496 = vmatpush.bf16.msrb.mxu0 %v2580_v2  ;;  %v3204_v62 = vld [vmem:[#allocation2 + $0x25c] sm:$0xf]  ;;  %v2387_v0 = vld [vmem:[#allocation2 + $0x18] sm:$0xf]  ;;  %v2676_v2 = vor.u32 %v3208_v59, %v2675_v58  ;;  %v3048_v56 = vor.u32 %v3298_v43, %v3045_v53  ;;  %v3294_v58 = vld [vmem:[#allocation5 + $0x124] sm:$0xf0] }
  0xb7   :  { %1510 = vmatpush.bf16.msrb.mxu1 %v2836_v3  ;;  %1524 = vmatpush.bf16.msrb.mxu2 %v2584_v6  ;;  %v2677_v63 = vld [vmem:[#allocation2 + $0x278] sm:$0xf0]  ;;  %v3136_v3 = vld [vmem:[#allocation2 + $0x34] sm:$0xf0]  ;;  %v2424_v6 = vor.u32 %v3140_v60, %v2421_v61  ;;  %v3290_v59 = vld [vmem:[#allocation5 + $0x10c] sm:$0xf] }
  0xb8   :  { %v2643_v4 = vld [vmem:[#allocation2 + $0x218] sm:$0xf]  ;;  %v3132_v8 = vld [vmem:[#allocation2 + $0x1c] sm:$0xf]  ;;  %v2388_v18 = vor.u32 %v3136_v3, %v2387_v0  ;;  %v3013_v60 = vld [vmem:[#allocation5 + $0x128] sm:$0xf0] }
  0xb9   :  { %1538 = vmatpush.bf16.msrb.mxu3 %v2840_v7  ;;  %v3200_v5 = vld [vmem:[#allocation2 + $0x234] sm:$0xf0]  ;;  %v2680_v7 = vor.u32 %v3204_v62, %v2677_v63  ;;  %v2389_v10 = vld [vmem:[#allocation2 + $0x38] sm:$0xf0]  ;;  %v2971_v62 = vld [vmem:[#allocation5 + $0xc0] sm:$0xf] }
  0xba   :  { %1497 = vmatpush.bf16.msrb.mxu0 %v2548_v15  ;;  %v3196_v11 = vld [vmem:[#allocation2 + $0x21c] sm:$0xf]  ;;  %v3313_v15 = vld [vmem:[#allocation5 + $0x1c4] sm:$0xf]  ;;  %v2392_v23 = vor.u32 %v3132_v8, %v2389_v10  ;;  %v3285_v63 = vld [vmem:[#allocation5 + $0xdc] sm:$0xf0] }
  0xbb   :  { %1511 = vmatpush.bf16.msrb.mxu1 %v2804_v16  ;;  %1525 = vmatpush.bf16.msrb.mxu2 %v2552_v19  ;;  %v2645_v12 = vld [vmem:[#allocation2 + $0x238] sm:$0xf0]  ;;  %v3101_v16 = vld [vmem:[#allocation5 + $0x1e0] sm:$0xf0]  ;;  %v2644_v19 = vor.u32 %v3200_v5, %v2643_v4  ;;  %v2979_v4 = vld [vmem:[#allocation5 + $0xc8] sm:$0xf]  ;;  %v2972_v8 = vor.u32 %v3285_v63, %v2971_v62 }
  0xbc   :  { %v2648_v24 = vor.u32 %v3196_v11, %v2645_v12  ;;  %v3104_v26 = vor.u32 %v3313_v15, %v3101_v16  ;;  %v2973_v3 = vld [vmem:[#allocation5 + $0xe0] sm:$0xf0]  ;;  %v3286_v5 = vld [vmem:[#allocation5 + $0xe4] sm:$0xf0]  ;;  %v2939_v11 = vld [vmem:[#allocation5 + $0x80] sm:$0xf] }
  0xbd   :  { %1539 = vmatpush.bf16.msrb.mxu3 %v2808_v20  ;;  %v3318_v20 = vld [vmem:[#allocation5 + $0x1e4] sm:$0xf0]  ;;  %v3277_v12 = vld [vmem:[#allocation5 + $0x9c] sm:$0xf0]  ;;  %v2980_v13 = vor.u32 %v3286_v5, %v2979_v4  ;;  %v3273_v15 = vld [vmem:[#allocation5 + $0x84] sm:$0xf] }
  0xbe   :  { %1498 = vmatpush.bf16.msrb.mxu0 %v2516_v27  ;;  %v3067_v27 = vld [vmem:[#allocation5 + $0x180] sm:$0xf]  ;;  %v3108_v29 = vor.u32 %v3318_v20, %v3107_v17  ;;  %v2941_v16 = vld [vmem:[#allocation5 + $0xa0] sm:$0xf0]  ;;  %v2947_v17 = vld [vmem:[#allocation5 + $0x88] sm:$0xf]  ;;  %v2940_v21 = vor.u32 %v3277_v12, %v2939_v11 }
  0xbf   :  { %1512 = vmatpush.bf16.msrb.mxu1 %v2772_v28  ;;  %1526 = vmatpush.bf16.msrb.mxu2 %v2520_v32  ;;  %v3309_v28 = vld [vmem:[#allocation5 + $0x19c] sm:$0xf0]  ;;  %v3305_v32 = vld [vmem:[#allocation5 + $0x184] sm:$0xf]  ;;  %v2949_v20 = vld [vmem:[#allocation5 + $0xa8] sm:$0xf0]  ;;  %v2944_v22 = vor.u32 %v3273_v15, %v2941_v16 }
  0xc0   :  { %v3068_v37 = vor.u32 %v3309_v28, %v3067_v27  ;;  %v3265_v27 = vld [vmem:[#allocation5 + $0x44] sm:$0xf]  ;;  %v2875_v33 = vld [vmem:[#allocation5] sm:$0xf]  ;;  %v3115_v51 = vld [vmem:[#allocation5 + $0x1d0] sm:$0xf] }
  0xc1   :  { %1540 = vmatpush.bf16.msrb.mxu3 %v2776_v30  ;;  %v3069_v30 = vld [vmem:[#allocation5 + $0x1a0] sm:$0xf0]  ;;  %v3261_v48 = vld [vmem:[#allocation5 + $0x1c] sm:$0xf0]  ;;  %v3319_v52 = vld [vmem:[#allocation5 + $0x1ec] sm:$0xf0] }
  0xc2   :  { %1499 = vmatpush.bf16.msrb.mxu0 %v2484_v39  ;;  %v3072_v38 = vor.u32 %v3305_v32, %v3069_v30  ;;  %v3035_v39 = vld [vmem:[#allocation5 + $0x140] sm:$0xf]  ;;  %v2909_v28 = vld [vmem:[#allocation5 + $0x60] sm:$0xf0]  ;;  %v3266_v32 = vld [vmem:[#allocation5 + $0x4c] sm:$0xf] }
  0xc3   :  { %1513 = vmatpush.bf16.msrb.mxu1 %v2740_v49  ;;  %1527 = vmatpush.bf16.msrb.mxu2 %v2488_v41  ;;  %v3301_v49 = vld [vmem:[#allocation5 + $0x15c] sm:$0xf0]  ;;  %v3297_v41 = vld [vmem:[#allocation5 + $0x144] sm:$0xf]  ;;  %v2917_v30 = vld [vmem:[#allocation5 + $0x68] sm:$0xf0]  ;;  %v2912_v36 = vor.u32 %v3265_v27, %v2909_v28 }
  0xc4   :  { %v3036_v44 = vor.u32 %v3301_v49, %v3035_v39  ;;  %v2920_v49 = vor.u32 %v3266_v32, %v2917_v30  ;;  %v3315_v43 = vld [vmem:[#allocation5 + $0x1d4] sm:$0xf]  ;;  %v3308_v4 = vld [vmem:[#allocation5 + $0x19c] sm:$0xf]  ;;  %v3303_v11 = vld [vmem:[#allocation5 + $0x16c] sm:$0xf0] }
  0xc5   :  { %1541 = vmatpush.bf16.msrb.mxu3 %v2744_v42  ;;  %v3037_v42 = vld [vmem:[#allocation5 + $0x160] sm:$0xf0]  ;;  %v3117_v53 = vld [vmem:[#allocation5 + $0x1f0] sm:$0xf0]  ;;  %v3093_v5 = vld [vmem:[#allocation5 + $0x1b8] sm:$0xf0] }
  0xc6   :  { %1500 = vmatpush.bf16.msrb.mxu0 %v2452_v45  ;;  %v3040_v54 = vor.u32 %v3297_v41, %v3037_v42  ;;  %v3003_v45 = vld [vmem:[#allocation5 + $0x100] sm:$0xf]  ;;  %v3258_v41 = vld [vmem:[#allocation5 + $0xc] sm:$0xf]  ;;  %v3053_v15 = vld [vmem:[#allocation5 + $0x170] sm:$0xf0] }
  0xc7   :  { %1514 = vmatpush.bf16.msrb.mxu1 %v2708_v55  ;;  %1528 = vmatpush.bf16.msrb.mxu2 %v2456_v47  ;;  %v3293_v55 = vld [vmem:[#allocation5 + $0x11c] sm:$0xf0]  ;;  %v3289_v47 = vld [vmem:[#allocation5 + $0x104] sm:$0xf]  ;;  %v2885_v42 = vld [vmem:[#allocation5 + $0x28] sm:$0xf0] }
  0xc8   :  { %v3004_v61 = vor.u32 %v3293_v55, %v3003_v45  ;;  %v3320_v55 = vld [vmem:[#allocation5 + $0x1f4] sm:$0xf0]  ;;  %v3021_v27 = vld [vmem:[#allocation5 + $0x130] sm:$0xf0]  ;;  %v3029_v32 = vld [vmem:[#allocation5 + $0x138] sm:$0xf0] }
  0xc9   :  { %1542 = vmatpush.bf16.msrb.mxu3 %v2712_v57  ;;  %v3005_v57 = vld [vmem:[#allocation5 + $0x120] sm:$0xf0]  ;;  %v3059_v16 = vld [vmem:[#allocation5 + $0x158] sm:$0xf] }
  0xca   :  { %1501 = vmatpush.bf16.msrb.mxu0 %v2420_v1  ;;  %v3016_v1 = vor.u32 %v3290_v59, %v3013_v60  ;;  %v3116_v59 = vor.u32 %v3319_v52, %v3115_v51  ;;  %v3120_v60 = vor.u32 %v3315_v43, %v3117_v53  ;;  %v3027_v28 = vld [vmem:[#allocation5 + $0x118] sm:$0xf]  ;;  %v2955_v52 = vld [vmem:[#allocation5 + $0x90] sm:$0xf] }
  0xcb   :  { %1515 = vmatpush.bf16.msrb.mxu1 %v2676_v2  ;;  %1529 = vmatpush.bf16.msrb.mxu2 %v2424_v6  ;;  %v3281_v2 = vld [vmem:[#allocation5 + $0xc4] sm:$0xf]  ;;  %v3282_v6 = vld [vmem:[#allocation5 + $0xcc] sm:$0xf]  ;;  %v3279_v43 = vld [vmem:[#allocation5 + $0xac] sm:$0xf0] }
  0xcc   :  { %v2976_v10 = vor.u32 %v3281_v2, %v2973_v3  ;;  %v3091_v2 = vld [vmem:[#allocation5 + $0x198] sm:$0xf] }
  0xcd   :  { %1543 = vmatpush.bf16.msrb.mxu3 %v2680_v7  ;;  %v2981_v7 = vld [vmem:[#allocation5 + $0xe8] sm:$0xf0]  ;;  %v3312_v3 = vld [vmem:[#allocation5 + $0x1b4] sm:$0xf0] }
  0xce   :  { %1502 = vmatpush.bf16.msrb.mxu0 %v2388_v18  ;;  %v2984_v14 = vor.u32 %v3282_v6, %v2981_v7  ;;  %v3278_v18 = vld [vmem:[#allocation5 + $0xa4] sm:$0xf0]  ;;  %v3092_v12 = vor.u32 %v3312_v3, %v3091_v2  ;;  %v2933_v2 = vld [vmem:[#allocation5 + $0x78] sm:$0xf0] }
  0xcf   :  { %1516 = vmatpush.bf16.msrb.mxu1 %v2644_v19  ;;  %1530 = vmatpush.bf16.msrb.mxu2 %v2392_v23  ;;  %v3274_v19 = vld [vmem:[#allocation5 + $0x8c] sm:$0xf]  ;;  %v2907_v23 = vld [vmem:[#allocation5 + $0x40] sm:$0xf] }
  0xd1   :  { %1544 = vmatpush.bf16.msrb.mxu3 %v2648_v24  ;;  %1503 = vmatmul.bf16.vlgmr.msrb.gmra.mxu0 %v3810_v35  ;;  %v3269_v24 = vld [vmem:[#allocation5 + $0x5c] sm:$0xf0] }
  0xd2   :  { %2044 = vmatpush.bf16.msra.mxu0 %v3100_v25  ;;  %1531 = vmatmul.bf16.vlgmr.msrb.gmra.mxu2 %v3810_v35  ;;  %v3011_v35 = vld [vmem:[#allocation5 + $0x108] sm:$0xf]  ;;  %v2948_v25 = vor.u32 %v3278_v18, %v2947_v17  ;;  %v2908_v34 = vor.u32 %v3269_v24, %v2907_v23  ;;  %v3304_v17 = vld [vmem:[#allocation5 + $0x174] sm:$0xf0]  ;;  %v3300_v18 = vld [vmem:[#allocation5 + $0x15c] sm:$0xf] }
  0xd3   :  { %2058 = vmatpush.bf16.msra.mxu1 %v3104_v26  ;;  %2072 = vmatpush.bf16.msra.mxu2 %v3108_v29  ;;  %v3012_v0 = vor.u32 %v3294_v58, %v3011_v35  ;;  %v2952_v26 = vor.u32 %v3274_v19, %v2949_v20  ;;  %v2915_v29 = vld [vmem:[#allocation5 + $0x48] sm:$0xf]  ;;  %v1639_v35 = vld [vmem:[%s4064_s1] sm:$0xff]  ;;  %v3061_v19 = vld [vmem:[#allocation5 + $0x178] sm:$0xf0]  ;;  %v3060_v24 = vor.u32 %v3304_v17, %v3059_v16 }
  0xd4   :  { %1517 = vmatmul.bf16.vlgmr.msrb.gmra.mxu1 %v3833_v9  ;;  %1545 = vmatmul.bf16.vlgmr.msrb.gmra.mxu3 %v3833_v9  ;;  %v3008_v9 = vor.u32 %v3289_v47, %v3005_v57  ;;  %v2888_v57 = vor.u32 %v3258_v41, %v2885_v42  ;;  %v1640_v58 = vld [vmem:[%s4064_s1 + $0x8] sm:$0xff]  ;;  %v3295_v23 = vld [vmem:[#allocation5 + $0x12c] sm:$0xf0]  ;;  %v2997_v41 = vld [vmem:[#allocation5 + $0xf8] sm:$0xf0] }
  0xd5   :  { %2086 = vmatpush.bf16.msra.mxu3 %v3112_v31  ;;  %v3270_v31 = vld [vmem:[#allocation5 + $0x64] sm:$0xf0]  ;;  %v3855_v6 = vpack.c.bf16 %v1640_v58, %v1639_v35  ;;  %v2923_v58 = vld [vmem:[#allocation5 + $0x50] sm:$0xf]  ;;  %v2901_v16 = vld [vmem:[#allocation5 + $0x38] sm:$0xf0] }
  0xd6   :  { %2045 = vmatpush.bf16.msra.mxu0 %v3068_v37  ;;  %v3257_v37 = vld [vmem:[#allocation5 + $0x4] sm:$0xf]  ;;  %v2916_v39 = vor.u32 %v3270_v31, %v2915_v29  ;;  %v3296_v29 = vld [vmem:[#allocation5 + $0x134] sm:$0xf0]  ;;  %v3292_v31 = vld [vmem:[#allocation5 + $0x11c] sm:$0xf] }
  0xd7   :  { %2059 = vmatpush.bf16.msra.mxu1 %v3072_v38  ;;  %2073 = vmatpush.bf16.msra.mxu2 %v3076_v50  ;;  %v2877_v38 = vld [vmem:[#allocation5 + $0x20] sm:$0xf0]  ;;  %v2883_v50 = vld [vmem:[#allocation5 + $0x8] sm:$0xf] }
  0xd8   :  { %v2880_v45 = vor.u32 %v3257_v37, %v2877_v38  ;;  %v3032_v37 = vor.u32 %v3292_v31, %v3029_v32  ;;  %v3283_v38 = vld [vmem:[#allocation5 + $0xd4] sm:$0xf] }
  0xd9   :  { %2087 = vmatpush.bf16.msra.mxu3 %v3080_v40  ;;  %v3262_v40 = vld [vmem:[#allocation5 + $0x24] sm:$0xf0] }
  0xda   :  { %2046 = vmatpush.bf16.msra.mxu0 %v3036_v44  ;;  %v3123_v44 = vld [vmem:[#allocation5 + $0x1d8] sm:$0xf]  ;;  %v2884_v47 = vor.u32 %v3262_v40, %v2883_v50  ;;  %v3284_v40 = vld [vmem:[#allocation5 + $0xdc] sm:$0xf] }
  0xdb   :  { %2060 = vmatpush.bf16.msra.mxu1 %v3040_v54  ;;  %2074 = vmatpush.bf16.msra.mxu2 %v3044_v46  ;;  %v2876_v54 = vor.u32 %v3261_v48, %v2875_v33  ;;  %v3316_v46 = vld [vmem:[#allocation5 + $0x1dc] sm:$0xf]  ;;  %v3124_v62 = vor.u32 %v3320_v55, %v3123_v44  ;;  %v3028_v48 = vor.u32 %v3296_v29, %v3027_v28  ;;  %v3288_v50 = vld [vmem:[#allocation5 + $0xf4] sm:$0xf0] }
  0xdc   :  { %v3000_v44 = vor.u32 %v3284_v40, %v2997_v41  ;;  %v2963_v55 = vld [vmem:[#allocation5 + $0x98] sm:$0xf] }
  0xdd   :  { %2088 = vmatpush.bf16.msra.mxu3 %v3048_v56  ;;  %v3125_v56 = vld [vmem:[#allocation5 + $0x1f8] sm:$0xf0] }
  0xde   :  { %2047 = vmatpush.bf16.msra.mxu0 %v3004_v61  ;;  %v3083_v61 = vld [vmem:[#allocation5 + $0x190] sm:$0xf]  ;;  %v3128_v63 = vor.u32 %v3316_v46, %v3125_v56  ;;  %v3280_v46 = vld [vmem:[#allocation5 + $0xb4] sm:$0xf0]  ;;  %v3276_v56 = vld [vmem:[#allocation5 + $0x9c] sm:$0xf] }
  0xdf   :  { %2061 = vmatpush.bf16.msra.mxu1 %v3008_v9  ;;  %2075 = vmatpush.bf16.msra.mxu2 %v3012_v0  ;;  %v3311_v9 = vld [vmem:[#allocation5 + $0x1ac] sm:$0xf0]  ;;  %v3307_v0 = vld [vmem:[#allocation5 + $0x194] sm:$0xf] }
  0xe0   :  { %v3084_v7 = vor.u32 %v3311_v9, %v3083_v61  ;;  %v3267_v9 = vld [vmem:[#allocation5 + $0x54] sm:$0xf] }
  0xe1   :  { %2089 = vmatpush.bf16.msra.mxu3 %v3016_v1  ;;  %v3085_v1 = vld [vmem:[#allocation5 + $0x1b0] sm:$0xf0] }
  0xe2   :  { %2048 = vmatpush.bf16.msra.mxu0 %v2972_v8  ;;  %v3088_v8 = vor.u32 %v3307_v0, %v3085_v1  ;;  %v3272_v0 = vld [vmem:[#allocation5 + $0x74] sm:$0xf0]  ;;  %v3268_v1 = vld [vmem:[#allocation5 + $0x5c] sm:$0xf] }
  0xe3   :  { %2062 = vmatpush.bf16.msra.mxu1 %v2976_v10  ;;  %2076 = vmatpush.bf16.msra.mxu2 %v2980_v13  ;;  %v3051_v10 = vld [vmem:[#allocation5 + $0x150] sm:$0xf]  ;;  %v3096_v13 = vor.u32 %v3308_v4, %v3093_v5 }
  0xe4   :  { %v3052_v20 = vor.u32 %v3303_v11, %v3051_v10  ;;  %v2891_v5 = vld [vmem:[#allocation5 + $0x10] sm:$0xf]  ;;  %v2936_v10 = vor.u32 %v3268_v1, %v2933_v2  ;;  %v3259_v11 = vld [vmem:[#allocation5 + $0x14] sm:$0xf] }
  0xe5   :  { %2090 = vmatpush.bf16.msra.mxu3 %v2984_v14  ;;  %v3299_v14 = vld [vmem:[#allocation5 + $0x154] sm:$0xf] }
  0xe6   :  { %2049 = vmatpush.bf16.msra.mxu0 %v2940_v21  ;;  %v3056_v21 = vor.u32 %v3299_v14, %v3053_v15  ;;  %v3264_v14 = vld [vmem:[#allocation5 + $0x34] sm:$0xf0]  ;;  %v3260_v15 = vld [vmem:[#allocation5 + $0x1c] sm:$0xf] }
  0xe7   :  { %2063 = vmatpush.bf16.msra.mxu1 %v2944_v22  ;;  %2077 = vmatpush.bf16.msra.mxu2 %v2948_v25  ;;  %v3019_v22 = vld [vmem:[#allocation5 + $0x110] sm:$0xf]  ;;  %v3064_v25 = vor.u32 %v3300_v18, %v3061_v19 }
  0xe8   :  { %v3020_v30 = vor.u32 %v3295_v23, %v3019_v22 }
  0xe9   :  { %2091 = vmatpush.bf16.msra.mxu3 %v2952_v26  ;;  %v3291_v26 = vld [vmem:[#allocation5 + $0x114] sm:$0xf] }
  0xea   :  { %2050 = vmatpush.bf16.msra.mxu0 %v2908_v34  ;;  %v3024_v33 = vor.u32 %v3291_v26, %v3021_v27  ;;  %v2987_v34 = vld [vmem:[#allocation5 + $0xd0] sm:$0xf] }
  0xeb   :  { %2064 = vmatpush.bf16.msra.mxu1 %v2912_v36  ;;  %2078 = vmatpush.bf16.msra.mxu2 %v2916_v39  ;;  %v3287_v36 = vld [vmem:[#allocation5 + $0xec] sm:$0xf0]  ;;  %v2989_v39 = vld [vmem:[#allocation5 + $0xf0] sm:$0xf0] }
  0xec   :  { %v2988_v42 = vor.u32 %v3287_v36, %v2987_v34  ;;  %v2992_v51 = vor.u32 %v3283_v38, %v2989_v39  ;;  %v3868_v36 = vld [vmem:[%s4066_s3] sm:$0xff] }
  0xed   :  { %2092 = vmatpush.bf16.msra.mxu3 %v2920_v49  ;;  %v2995_v49 = vld [vmem:[#allocation5 + $0xd8] sm:$0xf]  ;;  %v541_v38 = vperm.slane %v3868_v36, 1  ;;  %v542_v41 = vperm.slane %v3868_v36, 2 }
  0xee   :  { %2051 = vmatpush.bf16.msra.mxu0 %v2876_v54  ;;  %v2996_v53 = vor.u32 %v3288_v50, %v2995_v49  ;;  %v3275_v54 = vld [vmem:[#allocation5 + $0x94] sm:$0xf] }
  0xef   :  { %2065 = vmatpush.bf16.msra.mxu1 %v2880_v45  ;;  %2079 = vmatpush.bf16.msra.mxu2 %v2884_v47  ;;  %v2957_v45 = vld [vmem:[#allocation5 + $0xb0] sm:$0xf0]  ;;  %v2965_v47 = vld [vmem:[#allocation5 + $0xb8] sm:$0xf0] }
  0xf0   :  { %v2960_v35 = vor.u32 %v3275_v54, %v2957_v45  ;;  %v2968_v61 = vor.u32 %v3276_v56, %v2965_v47  ;;  %v544_v54 = vperm.slane %v3868_v36, 4 }
  0xf1   :  { %2093 = vmatpush.bf16.msra.mxu3 %v2888_v57  ;;  %2052 = vmatmul.bf16.vlgmr.msra.gmra.mxu0 %v3855_v6  ;;  %v2956_v57 = vor.u32 %v3279_v43, %v2955_v52 }
  0xf2   :  { %2100 = vmatpush.bf16.msrb.mxu0 %v3116_v59  ;;  %2080 = vmatmul.bf16.vlgmr.msra.gmra.mxu2 %v3855_v6  ;;  %v3271_v59 = vld [vmem:[#allocation5 + $0x6c] sm:$0xf0] }
  0xf3   :  { %2114 = vmatpush.bf16.msrb.mxu1 %v3120_v60  ;;  %2128 = vmatpush.bf16.msrb.mxu2 %v3124_v62  ;;  %v2964_v60 = vor.u32 %v3280_v46, %v2963_v55  ;;  %v2925_v62 = vld [vmem:[#allocation5 + $0x70] sm:$0xf0]  ;;  %v2924_v3 = vor.u32 %v3271_v59, %v2923_v58  ;;  %v545_v46 = vperm.slane %v3868_v36, 5 }
  0xf4   :  { %2094 = vmatmul.bf16.vlgmr.msra.gmra.mxu3 %v3855_v6  ;;  %2066 = vmatmul.bf16.vlgmr.msra.gmra.mxu1 %v3855_v6  ;;  %v2928_v4 = vor.u32 %v3267_v9, %v2925_v62  ;;  %v546_v62 = vperm.slane %v3868_v36, 6 }
  0xf5   :  { %2142 = vmatpush.bf16.msrb.mxu3 %v3128_v63  ;;  %v2931_v63 = vld [vmem:[#allocation5 + $0x58] sm:$0xf] }
  0xf6   :  { %2101 = vmatpush.bf16.msrb.mxu0 %v3084_v7  ;;  %v3263_v7 = vld [vmem:[#allocation5 + $0x2c] sm:$0xf0] }
  0xf7   :  { %2115 = vmatpush.bf16.msrb.mxu1 %v3088_v8  ;;  %2129 = vmatpush.bf16.msrb.mxu2 %v3092_v12  ;;  %v2932_v8 = vor.u32 %v3272_v0, %v2931_v63  ;;  %v2893_v12 = vld [vmem:[#allocation5 + $0x30] sm:$0xf0]  ;;  %v2892_v17 = vor.u32 %v3263_v7, %v2891_v5 }
  0xf8   :  { %v2896_v18 = vor.u32 %v3259_v11, %v2893_v12 }
  0xf9   :  { %2143 = vmatpush.bf16.msrb.mxu3 %v3096_v13  ;;  %v2899_v13 = vld [vmem:[#allocation5 + $0x18] sm:$0xf] }
  0xfa   :  { %2102 = vmatpush.bf16.msrb.mxu0 %v3052_v20  ;;  %v2900_v19 = vor.u32 %v3264_v14, %v2899_v13  ;;  %v2904_v20 = vor.u32 %v3260_v15, %v2901_v16 }
  0xfb   :  { %2116 = vmatpush.bf16.msrb.mxu1 %v3056_v21  ;;  %2130 = vmatpush.bf16.msrb.mxu2 %v3060_v24  ;;  %v1336_v21 = vpop.f32.mrf.mxu0  ;;  %v1364_v23 = vpop.f32.mrf.mxu2 }
  0xfc   :  { %v1365_v40 = vadd.f32 %v1364_v23, %v541_v38 }
  0xfd   :  { %2144 = vmatpush.bf16.msrb.mxu3 %v3064_v25 }
  0xfe   :  { %2103 = vmatpush.bf16.msrb.mxu0 %v3020_v30 }
  0xff   :  { %2117 = vmatpush.bf16.msrb.mxu1 %v3024_v33  ;;  %2131 = vmatpush.bf16.msrb.mxu2 %v3028_v48 }
 0x101   :  { %2145 = vmatpush.bf16.msrb.mxu3 %v3032_v37  ;;  %v540_v37 = vperm.slane %v3868_v36, 0 }
 0x102   :  { %2104 = vmatpush.bf16.msrb.mxu0 %v2988_v42 }
 0x103   :  { %2118 = vmatpush.bf16.msrb.mxu1 %v2992_v51  ;;  %2132 = vmatpush.bf16.msrb.mxu2 %v2996_v53  ;;  %v1338_v25 = vpop.f32.mrf.mxu0  ;;  %v1366_v27 = vpop.f32.mrf.mxu2  ;;  %v1337_v50 = vadd.f32 %v1336_v21, %v540_v37  ;;  %v543_v51 = vperm.slane %v3868_v36, 3 }
 0x104   :  { %v1339_v59 = vadd.f32 %v1338_v25, %v540_v37 }
 0x105   :  { %2146 = vmatpush.bf16.msrb.mxu3 %v3000_v44 }
 0x106   :  { %2105 = vmatpush.bf16.msrb.mxu0 %v2956_v57 }
 0x107   :  { %2119 = vmatpush.bf16.msrb.mxu1 %v2960_v35  ;;  %2133 = vmatpush.bf16.msrb.mxu2 %v2964_v60  ;;  %v1367_v60 = vadd.f32 %v1366_v27, %v541_v38 }
 0x109   :  { %2147 = vmatpush.bf16.msrb.mxu3 %v2968_v61  ;;  %v1350_v22 = vpop.f32.mrf.mxu1 }
 0x10a   :  { %2106 = vmatpush.bf16.msrb.mxu0 %v2924_v3  ;;  %v3874_v43 = vadd.f32 %v1350_v22, %v1337_v50 }
 0x10b   :  { %2120 = vmatpush.bf16.msrb.mxu1 %v2928_v4  ;;  %2134 = vmatpush.bf16.msrb.mxu2 %v2932_v8 }
 0x10c   :  { %v1551_v47 = vmul.f32 %v3874_v43, %v3874_v43 }
 0x10d   :  { %2148 = vmatpush.bf16.msrb.mxu3 %v2936_v10 }
 0x10e   :  { %2107 = vmatpush.bf16.msrb.mxu0 %v2892_v17  ;;  %v1392_v29 = vpop.f32.mrf.mxu0 }
 0x10f   :  { %2121 = vmatpush.bf16.msrb.mxu1 %v2896_v18  ;;  %2135 = vmatpush.bf16.msrb.mxu2 %v2900_v19  ;;  %v1378_v24 = vpop.f32.mrf.mxu3  ;;  %v1393_v44 = vadd.f32 %v1392_v29, %v542_v41 }
 0x110   :  { %v3876_v53 = vadd.f32 %v1378_v24, %v1365_v40 }
 0x111   :  { %2149 = vmatpush.bf16.msrb.mxu3 %v2904_v20  ;;  %2108 = vmatmul.bf16.vlgmr.msrb.gmra.mxu0 %v3855_v6  ;;  %v1352_v26 = vpop.f32.mrf.mxu1  ;;  %v547_v20 = vperm.slane %v3868_v36, 7 }
 0x112   :  { %2122 = vmatmul.bf16.vlgmr.msrb.gmra.mxu1 %v3855_v6  ;;  %2136 = vmatmul.bf16.vlgmr.msrb.gmra.mxu2 %v3855_v6  ;;  %v1552_v57 = vmul.f32 %v3876_v53, %v3876_v53  ;;  %v3893_v5 = vadd.f32 %v1352_v26, %v1339_v59 }
 0x114   :  { %2150 = vmatmul.bf16.vlgmr.msrb.gmra.mxu3 %v3855_v6  ;;  %v1567_v63 = vadd.f32 %v1552_v57, %v1551_v47  ;;  %v1559_v21 = vmul.f32 %v3893_v5, %v3893_v5 }
 0x115   :  { %v1420_v32 = vpop.f32.mrf.mxu2 }
 0x116   :  { %v1394_v33 = vpop.f32.mrf.mxu0  ;;  %v1421_v55 = vadd.f32 %v1420_v32, %v543_v51 }
 0x117   :  { %v1380_v28 = vpop.f32.mrf.mxu3  ;;  %v1395_v1 = vadd.f32 %v1394_v33, %v542_v41 }
 0x118   :  { %v3895_v7 = vadd.f32 %v1380_v28, %v1367_v60 }
 0x119   :  { %v1406_v31 = vpop.f32.mrf.mxu1 }
 0x11a   :  { %v3884_v35 = vadd.f32 %v1406_v31, %v1393_v44  ;;  %v1560_v22 = vmul.f32 %v3895_v7, %v3895_v7 }
 0x11c   :  { %v1553_v0 = vmul.f32 %v3884_v35, %v3884_v35 }
 0x11d   :  { %v1422_v6 = vpop.f32.mrf.mxu2 }
 0x11e   :  { %v1423_v8 = vadd.f32 %v1422_v6, %v543_v51  ;;  %v1568_v15 = vadd.f32 %v1567_v63, %v1553_v0 }
 0x11f   :  { %v1434_v30 = vpop.f32.mrf.mxu3 }
 0x120   :  { %v3886_v61 = vadd.f32 %v1434_v30, %v1421_v55 }
 0x121   :  { %v1408_v34 = vpop.f32.mrf.mxu1 }
 0x122   :  { %v1554_v11 = vmul.f32 %v3886_v61, %v3886_v61  ;;  %v3901_v16 = vadd.f32 %v1408_v34, %v1395_v1  ;;  %v1576_v34 = vadd.f32 %v1560_v22, %v1559_v21 }
 0x124   :  { %v1569_v24 = vadd.f32 %v1568_v15, %v1554_v11  ;;  %v1561_v27 = vmul.f32 %v3901_v16, %v3901_v16 }
 0x126   :  { %v1577_v50 = vadd.f32 %v1576_v34, %v1561_v27 }
 0x127   :  { %v1436_v48 = vpop.f32.mrf.mxu3 }
 0x128   :  { %v3912_v23 = vadd.f32 %v1436_v48, %v1423_v8 }
 0x12a   :  { %v1562_v36 = vmul.f32 %v3912_v23, %v3912_v23 }
 0x12e   :  { %v1448_v39 = vpop.f32.mrf.mxu0 }
 0x12f   :  { %v1449_v58 = vadd.f32 %v1448_v39, %v544_v54 }
 0x131   :  { %v1462_v49 = vpop.f32.mrf.mxu1 }
 0x132   :  { %v3891_v3 = vadd.f32 %v1462_v49, %v1449_v58 }
 0x134   :  { %v1555_v17 = vmul.f32 %v3891_v3, %v3891_v3 }
 0x135   :  { %v1476_v42 = vpop.f32.mrf.mxu2 }
 0x136   :  { %v1450_v45 = vpop.f32.mrf.mxu0  ;;  %v1477_v9 = vadd.f32 %v1476_v42, %v545_v46  ;;  %v1570_v29 = vadd.f32 %v1569_v24, %v1555_v17 }
 0x137   :  { %v1490_v52 = vpop.f32.mrf.mxu3  ;;  %v1451_v18 = vadd.f32 %v1450_v45, %v544_v54 }
 0x138   :  { %v3899_v12 = vadd.f32 %v1490_v52, %v1477_v9  ;;  %v1578_v52 = vadd.f32 %v1577_v50, %v1562_v36 }
 0x139   :  { %v1464_v56 = vpop.f32.mrf.mxu1 }
 0x13a   :  { %v1556_v25 = vmul.f32 %v3899_v12, %v3899_v12  ;;  %v3918_v31 = vadd.f32 %v1464_v56, %v1451_v18 }
 0x13c   :  { %v1571_v49 = vadd.f32 %v1570_v29, %v1556_v25  ;;  %v1563_v40 = vmul.f32 %v3918_v31, %v3918_v31 }
 0x13d   :  { %v1478_v2 = vpop.f32.mrf.mxu2 }
 0x13e   :  { %v1479_v26 = vadd.f32 %v1478_v2, %v545_v46  ;;  %v1579_v55 = vadd.f32 %v1578_v52, %v1563_v40 }
 0x13f   :  { %v1492_v4 = vpop.f32.mrf.mxu3 }
 0x140   :  { %v3924_v48 = vadd.f32 %v1492_v4, %v1479_v26 }
 0x142   :  { %v1564_v44 = vmul.f32 %v3924_v48, %v3924_v48 }
 0x144   :  { %v1580_v57 = vadd.f32 %v1579_v55, %v1564_v44 }
 0x14e   :  { %v1504_v10 = vpop.f32.mrf.mxu0 }
 0x14f   :  { %v1505_v13 = vadd.f32 %v1504_v10, %v546_v62 }
 0x151   :  { %v1518_v14 = vpop.f32.mrf.mxu1 }
 0x152   :  { %v3905_v19 = vadd.f32 %v1518_v14, %v1505_v13 }
 0x154   :  { %v1557_v32 = vmul.f32 %v3905_v19, %v3905_v19 }
 0x155   :  { %v1532_v28 = vpop.f32.mrf.mxu2 }
 0x156   :  { %v1533_v30 = vadd.f32 %v1532_v28, %v547_v20  ;;  %v1506_v6 = vpop.f32.mrf.mxu0  ;;  %v1572_v51 = vadd.f32 %v1571_v49, %v1557_v32 }
 0x157   :  { %v1546_v33 = vpop.f32.mrf.mxu3  ;;  %v1507_v37 = vadd.f32 %v1506_v6, %v546_v62  ;;  %v3945_v62 = vld [vmem:[%s4068_s5] sm:$0xff]  ;;  %s3443_s5 = smov [#allocation7]  }
 0x158   :  { %v3926_v38 = vadd.f32 %v1546_v33, %v1533_v30  ;;  %v1708_v1 = vperm.slane %v3945_v62, 0  ;;  %v1709_v2 = vperm.slane %v3945_v62, 1  ;;  %v1710_v11 = vperm.slane %v3945_v62, 2  ;;  %s2248_s15 = sshll.u32 %s3443_s5, 4  ;;  %s2249_s15 = int_to_ptr.vmem [resolvable:$true] %s2248_s15 }
 0x159   :  { %v1520_v39 = vpop.f32.mrf.mxu1  ;;  %v1711_v14 = vperm.slane %v3945_v62, 3  ;;  %v1712_v29 = vperm.slane %v3945_v62, 4  ;;  %v1713_v32 = vperm.slane %v3945_v62, 5  ;;  %v1715_v52 = vperm.slane %v3945_v62, 7 }
 0x15a   :  { %v3930_v41 = vadd.f32 %v1520_v39, %v1507_v37  ;;  %v1558_v42 = vmul.f32 %v3926_v38, %v3926_v38 }
 0x15c   :  { %v1573_v54 = vadd.f32 %v1572_v51, %v1558_v42  ;;  %v1565_v46 = vmul.f32 %v3930_v41, %v3930_v41  ;;  %v1714_v51 = vperm.slane %v3945_v62, 6 }
 0x15d   :  { %v1534_v45 = vpop.f32.mrf.mxu2 }
 0x15e   :  { %v1535_v56 = vadd.f32 %v1534_v45, %v547_v20  ;;  %1574 = vadd.xlane.f32.xlu0 %v1573_v54  ;;  %v1581_v60 = vadd.f32 %v1580_v57, %v1565_v46 }
 0x15f   :  { %v1548_v47 = vpop.f32.mrf.mxu3 }
 0x160   :  { %v3938_v58 = vadd.f32 %v1548_v47, %v1535_v56 }
 0x162   :  { %v1566_v59 = vmul.f32 %v3938_v58, %v3938_v58 }
 0x164   :  { %v1582_v9 = vadd.f32 %v1581_v60, %v1566_v59 }
 0x166   :  { %1583 = vadd.xlane.f32.xlu0 %v1582_v9 }
 0x16e   :  { %v2053_v63 = vpop.f32.mrf.mxu0 }
 0x16f   :  { %v3949_v8 = vadd.f32 %v2053_v63, %v1708_v1 }
 0x171   :  { %v2067_v0 = vpop.f32.mrf.mxu1  ;;  %v2156_v15 = vmul.f32 %v3949_v8, %v3949_v8 }
 0x172   :  { %v3951_v10 = vadd.f32 %v2067_v0, %v1709_v2 }
 0x174   :  { %v2157_v17 = vmul.f32 %v3951_v10, %v3951_v10 }
 0x175   :  { %v2081_v4 = vpop.f32.mrf.mxu2 }
 0x176   :  { %v3959_v18 = vadd.f32 %v2081_v4, %v1710_v11  ;;  %v2055_v20 = vpop.f32.mrf.mxu0  ;;  %v2172_v24 = vadd.f32 %v2157_v17, %v2156_v15 }
 0x177   :  { %v2095_v13 = vpop.f32.mrf.mxu3  ;;  %v3965_v26 = vadd.f32 %v2055_v20, %v1708_v1 }
 0x178   :  { %v3961_v22 = vadd.f32 %v2095_v13, %v1711_v14  ;;  %v2158_v25 = vmul.f32 %v3959_v18, %v3959_v18 }
 0x179   :  { %v2069_v21 = vpop.f32.mrf.mxu1  ;;  %v2164_v36 = vmul.f32 %v3965_v26, %v3965_v26 }
 0x17a   :  { %v3967_v27 = vadd.f32 %v2069_v21, %v1709_v2  ;;  %v2159_v30 = vmul.f32 %v3961_v22, %v3961_v22  ;;  %v2173_v34 = vadd.f32 %v2172_v24, %v2158_v25 }
 0x17c   :  { %v2165_v6 = vmul.f32 %v3967_v27, %v3967_v27  ;;  %v2174_v44 = vadd.f32 %v2173_v34, %v2159_v30 }
 0x17d   :  { %v2083_v28 = vpop.f32.mrf.mxu2 }
 0x17e   :  { %v3977_v37 = vadd.f32 %v2083_v28, %v1710_v11  ;;  %v2181_v54 = vadd.f32 %v2165_v6, %v2164_v36 }
 0x17f   :  { %v2097_v33 = vpop.f32.mrf.mxu3 }
 0x180   :  { %v2166_v45 = vmul.f32 %v3977_v37, %v3977_v37  ;;  %v3989_v55 = vadd.f32 %v2097_v33, %v1711_v14 }
 0x182   :  { %v2182_v59 = vadd.f32 %v2181_v54, %v2166_v45  ;;  %v2167_v60 = vmul.f32 %v3989_v55, %v3989_v55 }
 0x184   :  { %v2183_v14 = vadd.f32 %v2182_v59, %v2167_v60 }
 0x18e   :  { %v2109_v39 = vpop.f32.mrf.mxu0 }
 0x18f   :  { %v2123_v49 = vpop.f32.mrf.mxu1  ;;  %v3979_v50 = vadd.f32 %v2109_v39, %v1712_v29 }
 0x190   :  { %v3981_v40 = vadd.f32 %v2123_v49, %v1713_v32 }
 0x191   :  { %v2160_v42 = vmul.f32 %v3979_v50, %v3979_v50 }
 0x192   :  { %v2161_v56 = vmul.f32 %v3981_v40, %v3981_v40 }
 0x193   :  { %v2175_v46 = vadd.f32 %v2174_v44, %v2160_v42 }
 0x195   :  { %v2137_v47 = vpop.f32.mrf.mxu2  ;;  %v2176_v11 = vadd.f32 %v2175_v46, %v2161_v56 }
 0x196   :  { %v3995_v9 = vadd.f32 %v2137_v47, %v1714_v51  ;;  %v2111_v63 = vpop.f32.mrf.mxu0 }
 0x197   :  { %v2151_v57 = vpop.f32.mrf.mxu3  ;;  %v3999_v0 = vadd.f32 %v2111_v63, %v1712_v29  ;;  %v2125_v1 = vpop.f32.mrf.mxu1 }
 0x198   :  { %v3997_v62 = vadd.f32 %v2151_v57, %v1715_v52  ;;  %v2162_v2 = vmul.f32 %v3995_v9, %v3995_v9  ;;  %v4007_v15 = vadd.f32 %v2125_v1, %v1713_v32 }
 0x199   :  { %v2168_v13 = vmul.f32 %v3999_v0, %v3999_v0 }
 0x19a   :  { %v2163_v4 = vmul.f32 %v3997_v62, %v3997_v62  ;;  %v2177_v17 = vadd.f32 %v2176_v11, %v2162_v2  ;;  %v2169_v28 = vmul.f32 %v4007_v15, %v4007_v15 }
 0x19b   :  { %v2184_v20 = vadd.f32 %v2183_v14, %v2168_v13 }
 0x19c   :  { %v2178_v21 = vadd.f32 %v2177_v17, %v2163_v4 }
 0x19d   :  { %v2139_v24 = vpop.f32.mrf.mxu2  ;;  %v2185_v33 = vadd.f32 %v2184_v20, %v2169_v28 }
 0x19e   :  { %v4011_v29 = vadd.f32 %v2139_v24, %v1714_v51  ;;  %2179 = vadd.xlane.f32.xlu1 %v2178_v21 }
 0x19f   :  { %v2153_v25 = vpop.f32.mrf.mxu3 }
 0x1a0   :  { %v4013_v30 = vadd.f32 %v2153_v25, %v1715_v52  ;;  %v2170_v34 = vmul.f32 %v4011_v29, %v4011_v29 }
 0x1a2   :  { %v2171_v32 = vmul.f32 %v4013_v30, %v4013_v30  ;;  %v2186_v36 = vadd.f32 %v2185_v33, %v2170_v34 }
 0x1a4   :  { %v2187_v6 = vadd.f32 %v2186_v36, %v2171_v32 }
 0x1a6   :  { %2188 = vadd.xlane.f32.xlu1 %v2187_v6 }
 0x1d1   :  { %v1575_v39 = vpop.xlane.xlu0 %1574 }
 0x1d2   :  { %v1585_v49 = vmax.f32 %v1575_v39, 1e-24 }
 0x1d4   :  { %3327 = vrsqrt.f32 %v1585_v49  ;;  %vm1593_vm8 = vweird.f32 %v1585_v49 }
 0x1d9   :  { %v1584_v42 = vpop.xlane.xlu0 %1583 }
 0x1da   :  { %v3328_v44 = vpop.eup %3327  ;;  %v1586_v51 = vmax.f32 %v1584_v42, 1e-24 }
 0x1db   :  { %v1588_v54 = vmul.f32 %v3328_v44, %v1585_v49  ;;  %vm1594_vm7 = vweird.f32 %v3328_v44 }
 0x1dc   :  { %3329 = vrsqrt.f32 %v1586_v51  ;;  %vm1595_vm9 = vmor %vm1593_vm8, %vm1594_vm7  ;;  %vm1603_vm11 = vweird.f32 %v1586_v51 }
 0x1dd   :  { %v1589_v52 = vmul.f32 %v3328_v44, %v1588_v54 }
 0x1df   :  { %v1590_v45 = vmul.f32 0.5, %v1589_v52 }
 0x1e1   :  { %v1591_v46 = vsub.f32 1.5, %v1590_v45 }
 0x1e2   :  { %v3330_v56 = vpop.eup %3329 }
 0x1e3   :  { %v1592_v47 = vmul.f32 %v3328_v44, %v1591_v46  ;;  %v1598_v57 = vmul.f32 %v3330_v56, %v1586_v51  ;;  %vm1604_vm10 = vweird.f32 %v3330_v56 }
 0x1e4   :  { %vm1605_vm12 = vmor %vm1603_vm11, %vm1604_vm10 }
 0x1e5   :  { %v1596_v59 = vsel %vm1595_vm9, %v3328_v44, %v1592_v47  ;;  %v1599_v60 = vmul.f32 %v3330_v56, %v1598_v57 }
 0x1e6   :  { %v1607_v63 = vmul.f32 %v1596_v59, %v3874_v43  ;;  %v1608_v1 = vmul.f32 %v1596_v59, %v3876_v53  ;;  %v1609_v2 = vmul.f32 %v1596_v59, %v3884_v35  ;;  %v1610_v4 = vmul.f32 %v1596_v59, %v3886_v61 }
 0x1e7   :  { %v1611_v11 = vmul.f32 %v1596_v59, %v3891_v3  ;;  %v1612_v13 = vmul.f32 %v1596_v59, %v3899_v12  ;;  %v1613_v14 = vmul.f32 %v1596_v59, %v3905_v19  ;;  %v1614_v17 = vmul.f32 %v1596_v59, %v3926_v38 }
 0x1e8   :  { %v1623_v20 = vpack.c.bf16 %v1608_v1, %v1607_v63  ;;  %v1624_v21 = vpack.c.bf16 %v1610_v4, %v1609_v2  ;;  %v1600_v24 = vmul.f32 0.5, %v1599_v60 }
 0x1e9   :  { %v1625_v25 = vpack.c.bf16 %v1612_v13, %v1611_v11  ;;  %v1626_v28 = vpack.c.bf16 %v1614_v17, %v1613_v14 }
 0x1ea   :  { %1631 = vst [vmem:[#allocation7] sm:$0xff] %v1623_v20  ;;  %v1601_v43 = vsub.f32 1.5, %v1600_v24 }
 0x1eb   :  { %1632 = vst [vmem:[#allocation7 + $0x8] sm:$0xff] %v1624_v21 }
 0x1ec   :  { %1633 = vst [vmem:[#allocation7 + $0x10] sm:$0xff] %v1625_v25  ;;  %v1602_v53 = vmul.f32 %v3330_v56, %v1601_v43 }
 0x1ed   :  { %1634 = vst [vmem:[#allocation7 + $0x18] sm:$0xff] %v1626_v28 }
 0x1ee   :  { %v1606_v35 = vsel %vm1605_vm12, %v3330_v56, %v1602_v53 }
 0x1ef   :  { %v1615_v61 = vmul.f32 %v1606_v35, %v3893_v5  ;;  %v1616_v3 = vmul.f32 %v1606_v35, %v3895_v7  ;;  %v1617_v12 = vmul.f32 %v1606_v35, %v3901_v16  ;;  %v1618_v19 = vmul.f32 %v1606_v35, %v3912_v23 }
 0x1f0   :  { %v1619_v38 = vmul.f32 %v1606_v35, %v3918_v31  ;;  %v1620_v33 = vmul.f32 %v1606_v35, %v3924_v48  ;;  %v1621_v34 = vmul.f32 %v1606_v35, %v3930_v41  ;;  %v1622_v32 = vmul.f32 %v1606_v35, %v3938_v58 }
 0x1f1   :  { %v1627_v36 = vpack.c.bf16 %v1616_v3, %v1615_v61  ;;  %v1628_v6 = vpack.c.bf16 %v1618_v19, %v1617_v12 }
 0x1f2   :  { %v1629_v5 = vpack.c.bf16 %v1620_v33, %v1619_v38  ;;  %v1630_v7 = vpack.c.bf16 %v1622_v32, %v1621_v34 }
 0x1f3   :  { %1635 = vst [vmem:[#allocation7 + $0x20] sm:$0xff] %v1627_v36 }
 0x1f4   :  { %1636 = vst [vmem:[#allocation7 + $0x28] sm:$0xff] %v1628_v6 }
 0x1f5   :  { %1637 = vst [vmem:[#allocation7 + $0x30] sm:$0xff] %v1629_v5 }
 0x1f6   :  { %1638 = vst [vmem:[#allocation7 + $0x38] sm:$0xff] %v1630_v7 }
 0x1f7   :  { %2256 = dma.vmem_to_hbm [thread:$0]  %s2249_s15, 1024, %s2251_s18, [#allocation4], %s3440_s9, %s3440_s9, %s3441_s10  }
 0x211   :  { %v2180_v16 = vpop.xlane.xlu1 %2179 }
 0x212   :  { %v2190_v23 = vmax.f32 %v2180_v16, 1e-24 }
 0x214   :  { %3331 = vrsqrt.f32 %v2190_v23  ;;  %vm2198_vm14 = vweird.f32 %v2190_v23 }
 0x219   :  { %v2189_v31 = vpop.xlane.xlu1 %2188 }
 0x21a   :  { %v3332_v48 = vpop.eup %3331  ;;  %v2191_v41 = vmax.f32 %v2189_v31, 1e-24 }
 0x21b   :  { %v2193_v58 = vmul.f32 %v3332_v48, %v2190_v23  ;;  %vm2199_vm13 = vweird.f32 %v3332_v48 }
 0x21c   :  { %3333 = vrsqrt.f32 %v2191_v41  ;;  %vm2200_vm15 = vmor %vm2198_vm14, %vm2199_vm13  ;;  %vm2208_vm1 = vweird.f32 %v2191_v41 }
 0x21d   :  { %v2194_v39 = vmul.f32 %v3332_v48, %v2193_v58 }
 0x21f   :  { %v2195_v49 = vmul.f32 0.5, %v2194_v39 }
 0x221   :  { %v2196_v42 = vsub.f32 1.5, %v2195_v49 }
 0x222   :  { %v3334_v44 = vpop.eup %3333 }
 0x223   :  { %v2197_v51 = vmul.f32 %v3332_v48, %v2196_v42  ;;  %v2203_v54 = vmul.f32 %v3334_v44, %v2191_v41  ;;  %vm2209_vm0 = vweird.f32 %v3334_v44 }
 0x224   :  { %vm2210_vm2 = vmor %vm2208_vm1, %vm2209_vm0 }
 0x225   :  { %v2201_v52 = vsel %vm2200_vm15, %v3332_v48, %v2197_v51  ;;  %v2204_v45 = vmul.f32 %v3334_v44, %v2203_v54 }
 0x226   :  { %v2212_v46 = vmul.f32 %v2201_v52, %v3949_v8  ;;  %v2213_v56 = vmul.f32 %v2201_v52, %v3951_v10  ;;  %v2214_v47 = vmul.f32 %v2201_v52, %v3959_v18  ;;  %v2215_v57 = vmul.f32 %v2201_v52, %v3961_v22 }
 0x227   :  { %v2216_v59 = vmul.f32 %v2201_v52, %v3979_v50  ;;  %v2217_v60 = vmul.f32 %v2201_v52, %v3981_v40  ;;  %v2218_v63 = vmul.f32 %v2201_v52, %v3995_v9  ;;  %v2219_v1 = vmul.f32 %v2201_v52, %v3997_v62 }
 0x228   :  { %v2228_v2 = vpack.c.bf16 %v2213_v56, %v2212_v46  ;;  %v2229_v4 = vpack.c.bf16 %v2215_v57, %v2214_v47  ;;  %v2205_v11 = vmul.f32 0.5, %v2204_v45 }
 0x229   :  { %v2230_v13 = vpack.c.bf16 %v2217_v60, %v2216_v59  ;;  %v2231_v14 = vpack.c.bf16 %v2219_v1, %v2218_v63 }
 0x22a   :  { %2236 = vst [vmem:[#allocation8] sm:$0xff] %v2228_v2  ;;  %v2206_v8 = vsub.f32 1.5, %v2205_v11 }
 0x22b   :  { %2237 = vst [vmem:[#allocation8 + $0x8] sm:$0xff] %v2229_v4 }
 0x22c   :  { %2238 = vst [vmem:[#allocation8 + $0x10] sm:$0xff] %v2230_v13  ;;  %v2207_v10 = vmul.f32 %v3334_v44, %v2206_v8 }
 0x22d   :  { %2239 = vst [vmem:[#allocation8 + $0x18] sm:$0xff] %v2231_v14 }
 0x22e   :  { %v2211_v18 = vsel %vm2210_vm2, %v3334_v44, %v2207_v10 }
 0x22f   :  { %v2220_v22 = vmul.f32 %v2211_v18, %v3965_v26  ;;  %v2221_v50 = vmul.f32 %v2211_v18, %v3967_v27  ;;  %v2222_v40 = vmul.f32 %v2211_v18, %v3977_v37  ;;  %v2223_v9 = vmul.f32 %v2211_v18, %v3989_v55 }
 0x230   :  { %v2224_v62 = vmul.f32 %v2211_v18, %v3999_v0  ;;  %v2225_v17 = vmul.f32 %v2211_v18, %v4007_v15  ;;  %v2226_v20 = vmul.f32 %v2211_v18, %v4011_v29  ;;  %v2227_v21 = vmul.f32 %v2211_v18, %v4013_v30 }
 0x231   :  { %v2232_v24 = vpack.c.bf16 %v2221_v50, %v2220_v22  ;;  %v2233_v25 = vpack.c.bf16 %v2223_v9, %v2222_v40 }
 0x232   :  { %v2234_v26 = vpack.c.bf16 %v2225_v17, %v2224_v62  ;;  %v2235_v27 = vpack.c.bf16 %v2227_v21, %v2226_v20 }
 0x233   :  { %2240 = vst [vmem:[#allocation8 + $0x20] sm:$0xff] %v2232_v24 }
 0x234   :  { %2241 = vst [vmem:[#allocation8 + $0x28] sm:$0xff] %v2233_v25 }
 0x235   :  { %2242 = vst [vmem:[#allocation8 + $0x30] sm:$0xff] %v2234_v26 }
 0x236   :  { %2243 = vst [vmem:[#allocation8 + $0x38] sm:$0xff] %v2235_v27 }
 0x237   :  { %2269 = dma.vmem_to_hbm [thread:$0]  %s2262_s19, 1024, %s2264_s22, [#allocation9], %s3440_s9, %s3440_s9, %s3441_s10  }
 0x238   :  { %3435 = dma.done.wait [#allocation4], 1024  }
 0x239   :  { %3436 = vsyncadd [#allocation4], 4294966272 }
 0x23a   :  { %3437 = dma.done.wait [#allocation9], 1024  }
 0x23b   :  { %3438 = vsyncadd [#allocation9], 4294966272 }
 0x23c   :  { %2278 = vsyncpa [#allocation3], 1 }
 0x23d   :  { %2279 = vsyncpa [#allocation6], 1 }
 0x23e   :  { %2280 = vsyncpa [#allocation4], 1 }
 0x23f   :  { %2281 = vsyncpa [#allocation9], 1 }

</bundles_post_ra>
